<compile_context>
chip_gen: v5e
topology: v5e:2x2
jax: 0.10.0
libtpu: 0.0.40
codegen_flags: <defaults>
</compile_context>

<pallas_src>
import functools

import jax
import jax.numpy as jnp
from jax.experimental import pallas as pl
from jax.experimental.pallas import tpu as pltpu

_LN_EPS = 1e-5
_INV_SQRT2 = 0.7071067811865476
_VMEM_LIMIT_BYTES = 48 * 1024 * 1024  # <= v7x 64 MiB/TC, << v5e/v6e 128 MiB
_PARALLEL_1D = pltpu.CompilerParams(
    dimension_semantics=("parallel",),
    vmem_limit_bytes=_VMEM_LIMIT_BYTES,
)


# --------------------------------------------------------------------------
# Helpers
# --------------------------------------------------------------------------
def _round_up(x, m):
    return (x + m - 1) // m * m


def _pick_tile(m, cap=512):
    """Largest multiple-of-8 divisor of m (m is a multiple of 8) that is <= cap,
    preferring an even step count (v7x has 2 TensorCores) when that costs at
    most 2x in tile size."""
    if m <= cap:
        return m
    best = None
    best_even = None
    tm = cap - cap % 8
    while tm >= 8 and (best is None or best_even is None):
        if m % tm == 0:
            if best is None:
                best = tm
            if best_even is None and (m // tm) % 2 == 0:
                best_even = tm
        tm -= 8
    if best is None:
        return 8
    if best_even is not None and 2 * best_even >= best:
        return best_even
    return best


def _resident_spec(block_shape, index_map):
    """BlockSpec for a grid-invariant operand.

    Single-buffered: the index_map is constant, so double-buffering only wastes
    VMEM (e.g. 2x the 768x3072 bf16 FC1 weight).  Falls back to the default
    pipeline mode if this JAX version's BlockSpec has no `pipeline_mode`.
    """
    try:
        return pl.BlockSpec(block_shape, index_map, pipeline_mode=pl.Buffered(1))
    except TypeError:
        return pl.BlockSpec(block_shape, index_map)


# --------------------------------------------------------------------------
# Kernels
# --------------------------------------------------------------------------
def _ln_matmul_kernel(x_ref, g_ref, beta_ref, w_ref, b_ref, o_ref, *, gelu):
    """LayerNorm(x) @ W + b, optionally followed by exact (erf) GELU."""
    x = x_ref[...].astype(jnp.float32)                       # (TM, E)
    mu = jnp.mean(x, axis=-1, keepdims=True)
    xc = x - mu
    var = jnp.mean(xc * xc, axis=-1, keepdims=True)
    y = xc * jax.lax.rsqrt(var + _LN_EPS) * g_ref[...] + beta_ref[...]
    acc = jnp.dot(y.astype(jnp.bfloat16), w_ref[...],
                  preferred_element_type=jnp.float32)        # (TM, O_pad) f32
    acc = acc + b_ref[...]
    if gelu:  # exact GELU (matches nn.GELU default)
        acc = 0.5 * acc * (1.0 + jax.lax.erf(acc * _INV_SQRT2))
    o_ref[...] = acc.astype(o_ref.dtype)


def _matmul_residual_kernel(x_ref, w_ref, b_ref, res_ref, o_ref):
    """x @ W + b + residual, f32 accumulation and epilogue."""
    acc = jnp.dot(x_ref[...], w_ref[...], preferred_element_type=jnp.float32)
    o_ref[...] = (acc + b_ref[...] + res_ref[...]).astype(o_ref.dtype)


def _attn_proj_kernel(qkv_ref, res_ref, wp_ref, bp_ref, o_ref,
                      *, num_heads, head_dim, n_real, scale):
    """Per-batch MHSA + output projection + bias + residual.

    qkv_ref : (1, N_pad, >=3E) bf16, columns laid out [Q | K | V], each
              head-major (matches x @ Wqkv with PyTorch's reshape).
    res_ref : (1, N_pad, E) f32 original x (residual).
    Padded key columns (index >= n_real) are masked out of the softmax.
    """
    qkv = qkv_ref[0]
    res = res_ref[0]
    n_pad = qkv.shape[0]
    embed = num_heads * head_dim

    heads_out = []
    for h in range(num_heads):
        q = qkv[:, h * head_dim:(h + 1) * head_dim]                    # (N, Hd)
        k = qkv[:, embed + h * head_dim:embed + (h + 1) * head_dim]
        v = qkv[:, 2 * embed + h * head_dim:2 * embed + (h + 1) * head_dim]
        s = jax.lax.dot_general(q, k, (((1,), (1,)), ((), ())),
                                preferred_element_type=jnp.float32) * scale
        if n_real < n_pad:   # mask padded key columns
            col = jax.lax.broadcasted_iota(jnp.int32, s.shape, 1)
            s = jnp.where(col < n_real, s, -jnp.inf)
        m = jnp.max(s, axis=-1, keepdims=True)
        p = jnp.exp(s - m)
        denom = jnp.sum(p, axis=-1, keepdims=True)
        p = p * pl.reciprocal(denom, approx=True)       # EUP, off the VALU
        heads_out.append(jnp.dot(p.astype(jnp.bfloat16), v,
                                 preferred_element_type=jnp.float32))
    attn = jnp.concatenate(heads_out, axis=-1)          # (N_pad, E) f32

    proj = jnp.dot(attn.astype(jnp.bfloat16), wp_ref[...],
                   preferred_element_type=jnp.float32)
    o_ref[0] = (proj + bp_ref[...] + res).astype(o_ref.dtype)


# --------------------------------------------------------------------------
# Wrappers
# --------------------------------------------------------------------------
def _ln_matmul(x2, gamma2, beta2, w_p, b_p, *, gelu, tm):
    """x2: (M, E) f32 -> LN(x2) @ w_p + b_p (GELU optional) as (M, O_pad) bf16."""
    m, e = x2.shape
    o_pad = w_p.shape[1]
    cost = pl.CostEstimate(
        flops=2 * m * e * o_pad + 10 * m * e,
        transcendentals=(m * o_pad if gelu else 0) + m,
        bytes_accessed=(m * e * 4 + e * o_pad * 2 + o_pad * 4 + 2 * e * 4
                        + m * o_pad * 2),
    )
    return pl.pallas_call(
        functools.partial(_ln_matmul_kernel, gelu=gelu),
        out_shape=jax.ShapeDtypeStruct((m, o_pad), jnp.bfloat16),
        grid=(m // tm,),
        in_specs=[
            pl.BlockSpec((tm, e), lambda i: (i, 0)),
            _resident_spec((1, e), lambda i: (0, 0)),
            _resident_spec((1, e), lambda i: (0, 0)),
            _resident_spec((e, o_pad), lambda i: (0, 0)),   # resident weight
            _resident_spec((1, o_pad), lambda i: (0, 0)),
        ],
        out_specs=pl.BlockSpec((tm, o_pad), lambda i: (i, 0)),
        compiler_params=_PARALLEL_1D,
        cost_estimate=cost,
    )(x2, gamma2, beta2, w_p, b_p)


def _matmul_residual(x_bf16, w_p, b_p, res, *, tm):
    """x_bf16: (M, K) bf16, res: (M, E) f32 -> x @ w_p + b_p + res, f32."""
    m, k = x_bf16.shape
    e = w_p.shape[1]
    cost = pl.CostEstimate(
        flops=2 * m * k * e + 2 * m * e,
        transcendentals=0,
        bytes_accessed=m * k * 2 + k * e * 2 + e * 4 + 2 * m * e * 4,
    )
    return pl.pallas_call(
        _matmul_residual_kernel,
        out_shape=jax.ShapeDtypeStruct((m, e), jnp.float32),
        grid=(m // tm,),
        in_specs=[
            pl.BlockSpec((tm, k), lambda i: (i, 0)),
            _resident_spec((k, e), lambda i: (0, 0)),       # resident weight
            _resident_spec((1, e), lambda i: (0, 0)),
            pl.BlockSpec((tm, e), lambda i: (i, 0)),
        ],
        out_specs=pl.BlockSpec((tm, e), lambda i: (i, 0)),
        compiler_params=_PARALLEL_1D,
        cost_estimate=cost,
    )(x_bf16, w_p, b_p, res)


def _attention_proj(qkv, x_res, wproj, bproj, *, num_heads, n_real, scale):
    """qkv: (B, N_pad, >=3E) bf16, x_res: (B, N_pad, E) f32 -> x + proj(attn)."""
    b, n_pad, qkv_w = qkv.shape
    e = x_res.shape[-1]
    hd = e // num_heads
    cost = pl.CostEstimate(
        flops=4 * b * num_heads * n_pad * n_pad * hd + 2 * b * n_pad * e * e,
        transcendentals=b * num_heads * n_pad * n_pad,
        bytes_accessed=(b * n_pad * qkv_w * 2 + 2 * b * n_pad * e * 4
                        + e * e * 2 + e * 4),
    )
    return pl.pallas_call(
        functools.partial(_attn_proj_kernel, num_heads=num_heads, head_dim=hd,
                          n_real=n_real, scale=scale),
        out_shape=jax.ShapeDtypeStruct((b, n_pad, e), jnp.float32),
        grid=(b,),
        in_specs=[
            pl.BlockSpec((1, n_pad, qkv_w), lambda i: (i, 0, 0)),
            pl.BlockSpec((1, n_pad, e), lambda i: (i, 0, 0)),
            _resident_spec((e, e), lambda i: (0, 0)),       # resident Wproj
            _resident_spec((1, e), lambda i: (0, 0)),
        ],
        out_specs=pl.BlockSpec((1, n_pad, e), lambda i: (i, 0, 0)),
        compiler_params=_PARALLEL_1D,
        cost_estimate=cost,
    )(qkv, x_res, wproj, bproj)


# --------------------------------------------------------------------------
# Parameter prep (one-time) + forward
# --------------------------------------------------------------------------
def prepare_params(params):
    """One-time prep: pad weight output dims to a lane multiple (128), cast
    matmul operands to bf16, biases / LN params to f32 row vectors."""
    e = params["wqkv"].shape[0]
    mlp = params["w1"].shape[1]
    qkv_pad = _round_up(3 * e, 128)
    mlp_pad = _round_up(mlp, 128)

    def pad_cols(w, width):
        return jnp.pad(w, ((0, 0), (0, width - w.shape[1])))

    return {
        "ln1_g": params["ln1_g"].reshape(1, e).astype(jnp.float32),
        "ln1_b": params["ln1_b"].reshape(1, e).astype(jnp.float32),
        "ln2_g": params["ln2_g"].reshape(1, e).astype(jnp.float32),
        "ln2_b": params["ln2_b"].reshape(1, e).astype(jnp.float32),
        "wqkv": pad_cols(params["wqkv"], qkv_pad).astype(jnp.bfloat16),
        "bqkv": jnp.pad(params["bqkv"], (0, qkv_pad - 3 * e))
                   .reshape(1, qkv_pad).astype(jnp.float32),
        "wproj": params["wproj"].astype(jnp.bfloat16),
        "bproj": params["bproj"].reshape(1, e).astype(jnp.float32),
        "w1": pad_cols(params["w1"], mlp_pad).astype(jnp.bfloat16),
        "b1": jnp.pad(params["b1"], (0, mlp_pad - mlp))
                 .reshape(1, mlp_pad).astype(jnp.float32),
        # FC2: zero rows for the padded FC1 output columns (which are exactly 0),
        # so no activation slice is needed between FC1 and FC2.
        "w2": jnp.pad(params["w2"], ((0, mlp_pad - mlp), (0, 0)))
                 .astype(jnp.bfloat16),
        "b2": params["b2"].reshape(1, e).astype(jnp.float32),
    }


def transformer_block(x, prepped, num_heads):
    """Forward pass of the PyTorch TransformerBlock (eval mode).

    x: (B, N, E) f32.  `prepped` from prepare_params (weights are (in, out))."""
    b, n, e = x.shape
    assert e % num_heads == 0
    scale = float(e) ** -0.5          # NOTE: module uses embed_dim**-0.5

    n_pad = _round_up(n, 8)
    m_pad = b * n_pad
    tm = _pick_tile(m_pad)

    x_p = x if n_pad == n else jnp.pad(x, ((0, 0), (0, n_pad - n), (0, 0)))
    x2 = x_p.reshape(m_pad, e).astype(jnp.float32)

    # ---- x = x + proj(attn(norm1(x))) ----
    qkv = _ln_matmul(x2, prepped["ln1_g"], prepped["ln1_b"],
                     prepped["wqkv"], prepped["bqkv"], gelu=False, tm=tm)
    qkv = qkv.reshape(b, n_pad, -1)                     # free reshape, no transpose
    x2 = _attention_proj(qkv, x2.reshape(b, n_pad, e),
                         prepped["wproj"], prepped["bproj"],
                         num_heads=num_heads, n_real=n, scale=scale)
    x2 = x2.reshape(m_pad, e)

    # ---- x = x + fc2(gelu(fc1(norm2(x)))) ----
    h = _ln_matmul(x2, prepped["ln2_g"], prepped["ln2_b"],
                   prepped["w1"], prepped["b1"], gelu=True, tm=tm)
    out = _matmul_residual(h, prepped["w2"], prepped["b2"], x2, tm=tm)

    out = out.reshape(b, n_pad, e)
    return out if n_pad == n else out[:, :n, :]


# --------------------------------------------------------------------------
# Pure-JAX reference (same bf16 matmul-input rounding as the kernels)
# --------------------------------------------------------------------------
def _reference_block(x, params, num_heads):
    B, N, E = x.shape
    H = num_heads
    Hd = E // H
    scale = float(E) ** -0.5

    def ln(z, g, b):
        mu = jnp.mean(z, axis=-1, keepdims=True)
        zc = z - mu
        var = jnp.mean(zc * zc, axis=-1, keepdims=True)
        return zc * jax.lax.rsqrt(var + _LN_EPS) * g + b

    def mm(a, w, b):
        return jnp.dot(a.astype(jnp.bfloat16), w.astype(jnp.bfloat16),
                       preferred_element_type=jnp.float32) + b

    qkv = mm(ln(x, params["ln1_g"], params["ln1_b"]),
             params["wqkv"], params["bqkv"]).astype(jnp.bfloat16)
    qkv = qkv.reshape(B, N, 3, H, Hd)
    q = jnp.transpose(qkv[:, :, 0], (0, 2, 1, 3))
    k = jnp.transpose(qkv[:, :, 1], (0, 2, 1, 3))
    v = jnp.transpose(qkv[:, :, 2], (0, 2, 1, 3))
    s = jnp.einsum("bhqd,bhkd->bhqk", q, k,
                   preferred_element_type=jnp.float32) * scale
    p = jax.nn.softmax(s, axis=-1)
    o = jnp.einsum("bhqk,bhkd->bhqd", p.astype(jnp.bfloat16), v,
                   preferred_element_type=jnp.float32)
    o = jnp.transpose(o, (0, 2, 1, 3)).reshape(B, N, E).astype(jnp.bfloat16)
    x = x + mm(o, params["wproj"], params["bproj"])
    h = mm(ln(x, params["ln2_g"], params["ln2_b"]), params["w1"], params["b1"])
    h = (0.5 * h * (1.0 + jax.lax.erf(h * _INV_SQRT2))).astype(jnp.bfloat16)
    x = x + mm(h, params["w2"], params["b2"])
    return x


if __name__ == "__main__":
    # Small shapes consistent with the module: B=2, seq=8, embed=32, heads=4, mlp=64.
    B, N, E, H, MLP_DIM = 2, 8, 32, 4, 64

    key = jax.random.PRNGKey(0)
    ks = jax.random.split(key, 13)

    def uinit(k, shape, fan_in):
        lim = 1.0 / (fan_in ** 0.5)
        return jax.random.uniform(k, shape, jnp.float32, -lim, lim)

    params = {
        "ln1_g": 1.0 + 0.1 * jax.random.normal(ks[0], (E,), jnp.float32),
        "ln1_b": 0.1 * jax.random.normal(ks[1], (E,), jnp.float32),
        "wqkv": uinit(ks[2], (E, 3 * E), E),
        "bqkv": uinit(ks[3], (3 * E,), E),
        "wproj": uinit(ks[4], (E, E), E),
        "bproj": uinit(ks[5], (E,), E),
        "ln2_g": 1.0 + 0.1 * jax.random.normal(ks[6], (E,), jnp.float32),
        "ln2_b": 0.1 * jax.random.normal(ks[7], (E,), jnp.float32),
        "w1": uinit(ks[8], (E, MLP_DIM), E),
        "b1": uinit(ks[9], (MLP_DIM,), E),
        "w2": uinit(ks[10], (MLP_DIM, E), MLP_DIM),
        "b2": uinit(ks[11], (E,), MLP_DIM),
    }
    x = jax.random.normal(ks[12], (B, N, E), jnp.float32)

    prepped = prepare_params(params)                  # one-time weight prep
    fwd = jax.jit(transformer_block, static_argnums=2)
    out = jax.block_until_ready(fwd(x, prepped, H))

    ref = _reference_block(x, params, num_heads=H)
    assert out.shape == (B, N, E)
    assert jnp.allclose(out, ref, atol=1e-2, rtol=1e-2), float(
        jnp.max(jnp.abs(out - ref)))

    print("KERNEL_OK")
</pallas_src>

<mosaic_0001>
module attributes {stable_mosaic.version = 11 : i64} {
  func.func @_ln_matmul_kernel(%arg0: i32, %arg1: memref<16x32xf32, #tpu.memory_space<vmem>>, %arg2: memref<1x32xf32, #tpu.memory_space<vmem>>, %arg3: memref<1x32xf32, #tpu.memory_space<vmem>>, %arg4: memref<32x128xbf16, #tpu.memory_space<vmem>>, %arg5: memref<1x128xf32, #tpu.memory_space<vmem>>, %arg6: memref<16x128xbf16, #tpu.memory_space<vmem>>) attributes {dimension_semantics = [#tpu.dimension_semantics<parallel>], iteration_bounds = array<i64: 1>, scalar_prefetch = 0 : i64, scratch_operands = 0 : i64, tpu.core_type = #tpu.core_type<tc>, window_params = [{transform_indices = @transform_0, window_bounds = array<i64: 16, 32>}, {pipeline_mode = #tpu.pipeline_mode<synchronous>, transform_indices = @transform_1, window_bounds = array<i64: 1, 32>}, {pipeline_mode = #tpu.pipeline_mode<synchronous>, transform_indices = @transform_2, window_bounds = array<i64: 1, 32>}, {pipeline_mode = #tpu.pipeline_mode<synchronous>, transform_indices = @transform_3, window_bounds = array<i64: 32, 128>}, {pipeline_mode = #tpu.pipeline_mode<synchronous>, transform_indices = @transform_4, window_bounds = array<i64: 1, 128>}, {transform_indices = @transform_5, window_bounds = array<i64: 16, 128>}]} {
    %c0 = arith.constant 0 : index
    %c0_0 = arith.constant 0 : index
    %0 = vector.load %arg1[%c0, %c0_0] : memref<16x32xf32, #tpu.memory_space<vmem>>, vector<16x32xf32>
    %cst = arith.constant dense<0.000000e+00> : vector<16xf32>
    %1 = vector.multi_reduction <add>, %0, %cst [1] : vector<16x32xf32> to vector<16xf32>
    %2 = vector.shape_cast %1 : vector<16xf32> to vector<16x1xf32>
    %cst_1 = arith.constant 3.200000e+01 : f32
    %3 = vector.broadcast %cst_1 : f32 to vector<16x1xf32>
    %4 = arith.divf %2, %3 : vector<16x1xf32>
    %5 = vector.broadcast %4 : vector<16x1xf32> to vector<16x32xf32>
    %6 = arith.subf %0, %5 : vector<16x32xf32>
    %7 = arith.mulf %6, %6 : vector<16x32xf32>
    %cst_2 = arith.constant dense<0.000000e+00> : vector<16xf32>
    %8 = vector.multi_reduction <add>, %7, %cst_2 [1] : vector<16x32xf32> to vector<16xf32>
    %9 = vector.shape_cast %8 : vector<16xf32> to vector<16x1xf32>
    %cst_3 = arith.constant 3.200000e+01 : f32
    %10 = vector.broadcast %cst_3 : f32 to vector<16x1xf32>
    %11 = arith.divf %9, %10 : vector<16x1xf32>
    %cst_4 = arith.constant 9.99999974E-6 : f32
    %12 = vector.broadcast %cst_4 : f32 to vector<16x1xf32>
    %13 = arith.addf %11, %12 : vector<16x1xf32>
    %14 = math.rsqrt %13 : vector<16x1xf32>
    %15 = vector.broadcast %14 : vector<16x1xf32> to vector<16x32xf32>
    %16 = arith.mulf %6, %15 : vector<16x32xf32>
    %c0_5 = arith.constant 0 : index
    %c0_6 = arith.constant 0 : index
    %17 = vector.load %arg2[%c0_5, %c0_6] : memref<1x32xf32, #tpu.memory_space<vmem>>, vector<1x32xf32>
    %18 = vector.broadcast %17 : vector<1x32xf32> to vector<16x32xf32>
    %19 = arith.mulf %16, %18 : vector<16x32xf32>
    %c0_7 = arith.constant 0 : index
    %c0_8 = arith.constant 0 : index
    %20 = vector.load %arg3[%c0_7, %c0_8] : memref<1x32xf32, #tpu.memory_space<vmem>>, vector<1x32xf32>
    %21 = vector.broadcast %20 : vector<1x32xf32> to vector<16x32xf32>
    %22 = arith.addf %19, %21 : vector<16x32xf32>
    %23 = arith.truncf %22 : vector<16x32xf32> to vector<16x32xbf16>
    %c0_9 = arith.constant 0 : index
    %c0_10 = arith.constant 0 : index
    %24 = vector.load %arg4[%c0_9, %c0_10] : memref<32x128xbf16, #tpu.memory_space<vmem>>, vector<32x128xbf16>
    %cst_11 = arith.constant dense<0.000000e+00> : vector<16x128xf32>
    %25 = tpu.matmul %23, %24, %cst_11 {dimension_numbers = #tpu.dot_dimension_numbers<[1], [0], [0], [1], [0, 0, 1, 1], [], []>} : vector<16x32xbf16>, vector<32x128xbf16>, vector<16x128xf32> -> vector<16x128xf32>
    %c0_12 = arith.constant 0 : index
    %c0_13 = arith.constant 0 : index
    %26 = vector.load %arg5[%c0_12, %c0_13] : memref<1x128xf32, #tpu.memory_space<vmem>>, vector<1x128xf32>
    %27 = vector.broadcast %26 : vector<1x128xf32> to vector<16x128xf32>
    %28 = arith.addf %25, %27 : vector<16x128xf32>
    %cst_14 = arith.constant 5.000000e-01 : f32
    %29 = vector.broadcast %cst_14 : f32 to vector<16x128xf32>
    %30 = arith.mulf %29, %28 : vector<16x128xf32>
    %cst_15 = arith.constant 0.707106769 : f32
    %31 = vector.broadcast %cst_15 : f32 to vector<16x128xf32>
    %32 = arith.mulf %28, %31 : vector<16x128xf32>
    %33 = math.erf %32 : vector<16x128xf32>
    %cst_16 = arith.constant 1.000000e+00 : f32
    %34 = vector.broadcast %cst_16 : f32 to vector<16x128xf32>
    %35 = arith.addf %34, %33 : vector<16x128xf32>
    %36 = arith.mulf %30, %35 : vector<16x128xf32>
    %37 = arith.truncf %36 : vector<16x128xf32> to vector<16x128xbf16>
    %c0_17 = arith.constant 0 : index
    %c0_18 = arith.constant 0 : index
    %38 = vector.load %arg6[%c0_17, %c0_18] : memref<16x128xbf16, #tpu.memory_space<vmem>>, vector<16x128xbf16>
    tpu.vector_store %arg6[%c0_17, %c0_18], %37 {strides = array<i32>} : memref<16x128xbf16, #tpu.memory_space<vmem>>, vector<16x128xbf16>,
    return
  }
  func.func @transform_0(%arg0: i32) -> (i32, i32) {
    %c0_i32 = arith.constant 0 : i32
    %c0_i32_0 = arith.constant 0 : i32
    return %arg0, %c0_i32 : i32, i32
  }
  func.func @transform_1(%arg0: i32) -> (i32, i32) {
    %c0_i32 = arith.constant 0 : i32
    %c0_i32_0 = arith.constant 0 : i32
    %c0_i32_1 = arith.constant 0 : i32
    return %c0_i32, %c0_i32_0 : i32, i32
  }
  func.func @transform_2(%arg0: i32) -> (i32, i32) {
    %c0_i32 = arith.constant 0 : i32
    %c0_i32_0 = arith.constant 0 : i32
    %c0_i32_1 = arith.constant 0 : i32
    return %c0_i32, %c0_i32_0 : i32, i32
  }
  func.func @transform_3(%arg0: i32) -> (i32, i32) {
    %c0_i32 = arith.constant 0 : i32
    %c0_i32_0 = arith.constant 0 : i32
    %c0_i32_1 = arith.constant 0 : i32
    return %c0_i32, %c0_i32_0 : i32, i32
  }
  func.func @transform_4(%arg0: i32) -> (i32, i32) {
    %c0_i32 = arith.constant 0 : i32
    %c0_i32_0 = arith.constant 0 : i32
    %c0_i32_1 = arith.constant 0 : i32
    return %c0_i32, %c0_i32_0 : i32, i32
  }
  func.func @transform_5(%arg0: i32) -> (i32, i32) {
    %c0_i32 = arith.constant 0 : i32
    %c0_i32_0 = arith.constant 0 : i32
    return %arg0, %c0_i32 : i32, i32
  }
}

module attributes {stable_mosaic.version = 11 : i64} {
  func.func @_ln_matmul_kernel(%arg0: i32, %arg1: memref<16x32xf32, #tpu.memory_space<vmem>>, %arg2: memref<1x32xf32, #tpu.memory_space<vmem>>, %arg3: memref<1x32xf32, #tpu.memory_space<vmem>>, %arg4: memref<32x128xbf16, #tpu.memory_space<vmem>>, %arg5: memref<1x128xf32, #tpu.memory_space<vmem>>, %arg6: memref<16x128xbf16, #tpu.memory_space<vmem>>) attributes {dimension_semantics = [#tpu.dimension_semantics<parallel>], iteration_bounds = array<i64: 1>, scalar_prefetch = 0 : i64, scratch_operands = 0 : i64, tpu.core_type = #tpu.core_type<tc>, window_params = [{transform_indices = @transform_0, window_bounds = array<i64: 16, 32>}, {pipeline_mode = #tpu.pipeline_mode<synchronous>, transform_indices = @transform_1, window_bounds = array<i64: 1, 32>}, {pipeline_mode = #tpu.pipeline_mode<synchronous>, transform_indices = @transform_2, window_bounds = array<i64: 1, 32>}, {pipeline_mode = #tpu.pipeline_mode<synchronous>, transform_indices = @transform_3, window_bounds = array<i64: 32, 128>}, {pipeline_mode = #tpu.pipeline_mode<synchronous>, transform_indices = @transform_4, window_bounds = array<i64: 1, 128>}, {transform_indices = @transform_5, window_bounds = array<i64: 16, 128>}]} {
    %c0 = arith.constant 0 : index
    %c0_0 = arith.constant 0 : index
    %0 = vector.load %arg1[%c0, %c0_0] : memref<16x32xf32, #tpu.memory_space<vmem>>, vector<16x32xf32>
    %cst = arith.constant dense<0.000000e+00> : vector<16xf32>
    %1 = vector.multi_reduction <add>, %0, %cst [1] : vector<16x32xf32> to vector<16xf32>
    %2 = vector.shape_cast %1 : vector<16xf32> to vector<16x1xf32>
    %cst_1 = arith.constant 3.200000e+01 : f32
    %3 = vector.broadcast %cst_1 : f32 to vector<16x1xf32>
    %4 = arith.divf %2, %3 : vector<16x1xf32>
    %5 = vector.broadcast %4 : vector<16x1xf32> to vector<16x32xf32>
    %6 = arith.subf %0, %5 : vector<16x32xf32>
    %7 = arith.mulf %6, %6 : vector<16x32xf32>
    %cst_2 = arith.constant dense<0.000000e+00> : vector<16xf32>
    %8 = vector.multi_reduction <add>, %7, %cst_2 [1] : vector<16x32xf32> to vector<16xf32>
    %9 = vector.shape_cast %8 : vector<16xf32> to vector<16x1xf32>
    %cst_3 = arith.constant 3.200000e+01 : f32
    %10 = vector.broadcast %cst_3 : f32 to vector<16x1xf32>
    %11 = arith.divf %9, %10 : vector<16x1xf32>
    %cst_4 = arith.constant 9.99999974E-6 : f32
    %12 = vector.broadcast %cst_4 : f32 to vector<16x1xf32>
    %13 = arith.addf %11, %12 : vector<16x1xf32>
    %14 = math.rsqrt %13 : vector<16x1xf32>
    %15 = vector.broadcast %14 : vector<16x1xf32> to vector<16x32xf32>
    %16 = arith.mulf %6, %15 : vector<16x32xf32>
    %c0_5 = arith.constant 0 : index
    %c0_6 = arith.constant 0 : index
    %17 = vector.load %arg2[%c0_5, %c0_6] : memref<1x32xf32, #tpu.memory_space<vmem>>, vector<1x32xf32>
    %18 = vector.broadcast %17 : vector<1x32xf32> to vector<16x32xf32>
    %19 = arith.mulf %16, %18 : vector<16x32xf32>
    %c0_7 = arith.constant 0 : index
    %c0_8 = arith.constant 0 : index
    %20 = vector.load %arg3[%c0_7, %c0_8] : memref<1x32xf32, #tpu.memory_space<vmem>>, vector<1x32xf32>
    %21 = vector.broadcast %20 : vector<1x32xf32> to vector<16x32xf32>
    %22 = arith.addf %19, %21 : vector<16x32xf32>
    %23 = arith.truncf %22 : vector<16x32xf32> to vector<16x32xbf16>
    %c0_9 = arith.constant 0 : index
    %c0_10 = arith.constant 0 : index
    %24 = vector.load %arg4[%c0_9, %c0_10] : memref<32x128xbf16, #tpu.memory_space<vmem>>, vector<32x128xbf16>
    %cst_11 = arith.constant dense<0.000000e+00> : vector<16x128xf32>
    %25 = tpu.matmul %23, %24, %cst_11 {dimension_numbers = #tpu.dot_dimension_numbers<[1], [0], [0], [1], [0, 0, 1, 1], [], []>} : vector<16x32xbf16>, vector<32x128xbf16>, vector<16x128xf32> -> vector<16x128xf32>
    %c0_12 = arith.constant 0 : index
    %c0_13 = arith.constant 0 : index
    %26 = vector.load %arg5[%c0_12, %c0_13] : memref<1x128xf32, #tpu.memory_space<vmem>>, vector<1x128xf32>
    %27 = vector.broadcast %26 : vector<1x128xf32> to vector<16x128xf32>
    %28 = arith.addf %25, %27 : vector<16x128xf32>
    %29 = arith.truncf %28 : vector<16x128xf32> to vector<16x128xbf16>
    %c0_14 = arith.constant 0 : index
    %c0_15 = arith.constant 0 : index
    %30 = vector.load %arg6[%c0_14, %c0_15] : memref<16x128xbf16, #tpu.memory_space<vmem>>, vector<16x128xbf16>
    tpu.vector_store %arg6[%c0_14, %c0_15], %29 {strides = array<i32>} : memref<16x128xbf16, #tpu.memory_space<vmem>>, vector<16x128xbf16>,
    return
  }
  func.func @transform_0(%arg0: i32) -> (i32, i32) {
    %c0_i32 = arith.constant 0 : i32
    %c0_i32_0 = arith.constant 0 : i32
    return %arg0, %c0_i32 : i32, i32
  }
  func.func @transform_1(%arg0: i32) -> (i32, i32) {
    %c0_i32 = arith.constant 0 : i32
    %c0_i32_0 = arith.constant 0 : i32
    %c0_i32_1 = arith.constant 0 : i32
    return %c0_i32, %c0_i32_0 : i32, i32
  }
  func.func @transform_2(%arg0: i32) -> (i32, i32) {
    %c0_i32 = arith.constant 0 : i32
    %c0_i32_0 = arith.constant 0 : i32
    %c0_i32_1 = arith.constant 0 : i32
    return %c0_i32, %c0_i32_0 : i32, i32
  }
  func.func @transform_3(%arg0: i32) -> (i32, i32) {
    %c0_i32 = arith.constant 0 : i32
    %c0_i32_0 = arith.constant 0 : i32
    %c0_i32_1 = arith.constant 0 : i32
    return %c0_i32, %c0_i32_0 : i32, i32
  }
  func.func @transform_4(%arg0: i32) -> (i32, i32) {
    %c0_i32 = arith.constant 0 : i32
    %c0_i32_0 = arith.constant 0 : i32
    %c0_i32_1 = arith.constant 0 : i32
    return %c0_i32, %c0_i32_0 : i32, i32
  }
  func.func @transform_5(%arg0: i32) -> (i32, i32) {
    %c0_i32 = arith.constant 0 : i32
    %c0_i32_0 = arith.constant 0 : i32
    return %arg0, %c0_i32 : i32, i32
  }
}

module attributes {stable_mosaic.version = 11 : i64} {
  func.func @_attn_proj_kernel(%arg0: i32, %arg1: memref<1x8x128xbf16, #tpu.memory_space<vmem>>, %arg2: memref<1x8x32xf32, #tpu.memory_space<vmem>>, %arg3: memref<32x32xbf16, #tpu.memory_space<vmem>>, %arg4: memref<1x32xf32, #tpu.memory_space<vmem>>, %arg5: memref<1x8x32xf32, #tpu.memory_space<vmem>>) attributes {dimension_semantics = [#tpu.dimension_semantics<parallel>], iteration_bounds = array<i64: 2>, scalar_prefetch = 0 : i64, scratch_operands = 0 : i64, tpu.core_type = #tpu.core_type<tc>, window_params = [{transform_indices = @transform_0, window_bounds = array<i64: 1, 8, 128>}, {transform_indices = @transform_1, window_bounds = array<i64: 1, 8, 32>}, {pipeline_mode = #tpu.pipeline_mode<synchronous>, transform_indices = @transform_2, window_bounds = array<i64: 32, 32>}, {pipeline_mode = #tpu.pipeline_mode<synchronous>, transform_indices = @transform_3, window_bounds = array<i64: 1, 32>}, {transform_indices = @transform_4, window_bounds = array<i64: 1, 8, 32>}]} {
    %c0 = arith.constant 0 : index
    %c0_0 = arith.constant 0 : index
    %c0_1 = arith.constant 0 : index
    %0 = vector.load %arg1[%c0, %c0_0, %c0_1] : memref<1x8x128xbf16, #tpu.memory_space<vmem>>, vector<1x8x128xbf16>
    %1 = vector.shape_cast %0 : vector<1x8x128xbf16> to vector<8x128xbf16>
    %c0_2 = arith.constant 0 : index
    %c0_3 = arith.constant 0 : index
    %c0_4 = arith.constant 0 : index
    %2 = vector.load %arg2[%c0_2, %c0_3, %c0_4] : memref<1x8x32xf32, #tpu.memory_space<vmem>>, vector<1x8x32xf32>
    %3 = vector.shape_cast %2 : vector<1x8x32xf32> to vector<8x32xf32>
    %4 = vector.extract_strided_slice %1 {offsets = [0, 0], sizes = [8, 8], strides = [1, 1]} : vector<8x128xbf16> to vector<8x8xbf16>
    %5 = vector.extract_strided_slice %1 {offsets = [0, 32], sizes = [8, 8], strides = [1, 1]} : vector<8x128xbf16> to vector<8x8xbf16>
    %6 = vector.extract_strided_slice %1 {offsets = [0, 64], sizes = [8, 8], strides = [1, 1]} : vector<8x128xbf16> to vector<8x8xbf16>
    %cst = arith.constant dense<0.000000e+00> : vector<8x8xf32>
    %7 = tpu.matmul %4, %5, %cst {dimension_numbers = #tpu.dot_dimension_numbers<[1], [1], [0], [0], [0, 0, 1, 0], [], []>} : vector<8x8xbf16>, vector<8x8xbf16>, vector<8x8xf32> -> vector<8x8xf32>
    %cst_5 = arith.constant 0.176776692 : f32
    %8 = vector.broadcast %cst_5 : f32 to vector<8x8xf32>
    %9 = arith.mulf %7, %8 : vector<8x8xf32>
    %cst_6 = arith.constant dense<0xFF800000> : vector<8xf32>
    %10 = vector.multi_reduction <maximumf>, %9, %cst_6 [1] : vector<8x8xf32> to vector<8xf32>
    %11 = vector.shape_cast %10 : vector<8xf32> to vector<8x1xf32>
    %12 = vector.broadcast %11 : vector<8x1xf32> to vector<8x8xf32>
    %13 = arith.subf %9, %12 : vector<8x8xf32>
    %14 = math.exp %13 : vector<8x8xf32>
    %cst_7 = arith.constant dense<0.000000e+00> : vector<8xf32>
    %15 = vector.multi_reduction <add>, %14, %cst_7 [1] : vector<8x8xf32> to vector<8xf32>
    %16 = vector.shape_cast %15 : vector<8xf32> to vector<8x1xf32>
    %17 = tpu.reciprocal %16 {approx = true} : vector<8x1xf32> -> vector<8x1xf32>
    %18 = vector.broadcast %17 : vector<8x1xf32> to vector<8x8xf32>
    %19 = arith.mulf %14, %18 : vector<8x8xf32>
    %20 = arith.truncf %19 : vector<8x8xf32> to vector<8x8xbf16>
    %cst_8 = arith.constant dense<0.000000e+00> : vector<8x8xf32>
    %21 = tpu.matmul %20, %6, %cst_8 {dimension_numbers = #tpu.dot_dimension_numbers<[1], [0], [0], [1], [0, 0, 1, 1], [], []>} : vector<8x8xbf16>, vector<8x8xbf16>, vector<8x8xf32> -> vector<8x8xf32>
    %22 = vector.extract_strided_slice %1 {offsets = [0, 8], sizes = [8, 8], strides = [1, 1]} : vector<8x128xbf16> to vector<8x8xbf16>
    %23 = vector.extract_strided_slice %1 {offsets = [0, 40], sizes = [8, 8], strides = [1, 1]} : vector<8x128xbf16> to vector<8x8xbf16>
    %24 = vector.extract_strided_slice %1 {offsets = [0, 72], sizes = [8, 8], strides = [1, 1]} : vector<8x128xbf16> to vector<8x8xbf16>
    %cst_9 = arith.constant dense<0.000000e+00> : vector<8x8xf32>
    %25 = tpu.matmul %22, %23, %cst_9 {dimension_numbers = #tpu.dot_dimension_numbers<[1], [1], [0], [0], [0, 0, 1, 0], [], []>} : vector<8x8xbf16>, vector<8x8xbf16>, vector<8x8xf32> -> vector<8x8xf32>
    %cst_10 = arith.constant 0.176776692 : f32
    %26 = vector.broadcast %cst_10 : f32 to vector<8x8xf32>
    %27 = arith.mulf %25, %26 : vector<8x8xf32>
    %cst_11 = arith.constant dense<0xFF800000> : vector<8xf32>
    %28 = vector.multi_reduction <maximumf>, %27, %cst_11 [1] : vector<8x8xf32> to vector<8xf32>
    %29 = vector.shape_cast %28 : vector<8xf32> to vector<8x1xf32>
    %30 = vector.broadcast %29 : vector<8x1xf32> to vector<8x8xf32>
    %31 = arith.subf %27, %30 : vector<8x8xf32>
    %32 = math.exp %31 : vector<8x8xf32>
    %cst_12 = arith.constant dense<0.000000e+00> : vector<8xf32>
    %33 = vector.multi_reduction <add>, %32, %cst_12 [1] : vector<8x8xf32> to vector<8xf32>
    %34 = vector.shape_cast %33 : vector<8xf32> to vector<8x1xf32>
    %35 = tpu.reciprocal %34 {approx = true} : vector<8x1xf32> -> vector<8x1xf32>
    %36 = vector.broadcast %35 : vector<8x1xf32> to vector<8x8xf32>
    %37 = arith.mulf %32, %36 : vector<8x8xf32>
    %38 = arith.truncf %37 : vector<8x8xf32> to vector<8x8xbf16>
    %cst_13 = arith.constant dense<0.000000e+00> : vector<8x8xf32>
    %39 = tpu.matmul %38, %24, %cst_13 {dimension_numbers = #tpu.dot_dimension_numbers<[1], [0], [0], [1], [0, 0, 1, 1], [], []>} : vector<8x8xbf16>, vector<8x8xbf16>, vector<8x8xf32> -> vector<8x8xf32>
    %40 = vector.extract_strided_slice %1 {offsets = [0, 16], sizes = [8, 8], strides = [1, 1]} : vector<8x128xbf16> to vector<8x8xbf16>
    %41 = vector.extract_strided_slice %1 {offsets = [0, 48], sizes = [8, 8], strides = [1, 1]} : vector<8x128xbf16> to vector<8x8xbf16>
    %42 = vector.extract_strided_slice %1 {offsets = [0, 80], sizes = [8, 8], strides = [1, 1]} : vector<8x128xbf16> to vector<8x8xbf16>
    %cst_14 = arith.constant dense<0.000000e+00> : vector<8x8xf32>
    %43 = tpu.matmul %40, %41, %cst_14 {dimension_numbers = #tpu.dot_dimension_numbers<[1], [1], [0], [0], [0, 0, 1, 0], [], []>} : vector<8x8xbf16>, vector<8x8xbf16>, vector<8x8xf32> -> vector<8x8xf32>
    %cst_15 = arith.constant 0.176776692 : f32
    %44 = vector.broadcast %cst_15 : f32 to vector<8x8xf32>
    %45 = arith.mulf %43, %44 : vector<8x8xf32>
    %cst_16 = arith.constant dense<0xFF800000> : vector<8xf32>
    %46 = vector.multi_reduction <maximumf>, %45, %cst_16 [1] : vector<8x8xf32> to vector<8xf32>
    %47 = vector.shape_cast %46 : vector<8xf32> to vector<8x1xf32>
    %48 = vector.broadcast %47 : vector<8x1xf32> to vector<8x8xf32>
    %49 = arith.subf %45, %48 : vector<8x8xf32>
    %50 = math.exp %49 : vector<8x8xf32>
    %cst_17 = arith.constant dense<0.000000e+00> : vector<8xf32>
    %51 = vector.multi_reduction <add>, %50, %cst_17 [1] : vector<8x8xf32> to vector<8xf32>
    %52 = vector.shape_cast %51 : vector<8xf32> to vector<8x1xf32>
    %53 = tpu.reciprocal %52 {approx = true} : vector<8x1xf32> -> vector<8x1xf32>
    %54 = vector.broadcast %53 : vector<8x1xf32> to vector<8x8xf32>
    %55 = arith.mulf %50, %54 : vector<8x8xf32>
    %56 = arith.truncf %55 : vector<8x8xf32> to vector<8x8xbf16>
    %cst_18 = arith.constant dense<0.000000e+00> : vector<8x8xf32>
    %57 = tpu.matmul %56, %42, %cst_18 {dimension_numbers = #tpu.dot_dimension_numbers<[1], [0], [0], [1], [0, 0, 1, 1], [], []>} : vector<8x8xbf16>, vector<8x8xbf16>, vector<8x8xf32> -> vector<8x8xf32>
    %58 = vector.extract_strided_slice %1 {offsets = [0, 24], sizes = [8, 8], strides = [1, 1]} : vector<8x128xbf16> to vector<8x8xbf16>
    %59 = vector.extract_strided_slice %1 {offsets = [0, 56], sizes = [8, 8], strides = [1, 1]} : vector<8x128xbf16> to vector<8x8xbf16>
    %60 = vector.extract_strided_slice %1 {offsets = [0, 88], sizes = [8, 8], strides = [1, 1]} : vector<8x128xbf16> to vector<8x8xbf16>
    %cst_19 = arith.constant dense<0.000000e+00> : vector<8x8xf32>
    %61 = tpu.matmul %58, %59, %cst_19 {dimension_numbers = #tpu.dot_dimension_numbers<[1], [1], [0], [0], [0, 0, 1, 0], [], []>} : vector<8x8xbf16>, vector<8x8xbf16>, vector<8x8xf32> -> vector<8x8xf32>
    %cst_20 = arith.constant 0.176776692 : f32
    %62 = vector.broadcast %cst_20 : f32 to vector<8x8xf32>
    %63 = arith.mulf %61, %62 : vector<8x8xf32>
    %cst_21 = arith.constant dense<0xFF800000> : vector<8xf32>
    %64 = vector.multi_reduction <maximumf>, %63, %cst_21 [1] : vector<8x8xf32> to vector<8xf32>
    %65 = vector.shape_cast %64 : vector<8xf32> to vector<8x1xf32>
    %66 = vector.broadcast %65 : vector<8x1xf32> to vector<8x8xf32>
    %67 = arith.subf %63, %66 : vector<8x8xf32>
    %68 = math.exp %67 : vector<8x8xf32>
    %cst_22 = arith.constant dense<0.000000e+00> : vector<8xf32>
    %69 = vector.multi_reduction <add>, %68, %cst_22 [1] : vector<8x8xf32> to vector<8xf32>
    %70 = vector.shape_cast %69 : vector<8xf32> to vector<8x1xf32>
    %71 = tpu.reciprocal %70 {approx = true} : vector<8x1xf32> -> vector<8x1xf32>
    %72 = vector.broadcast %71 : vector<8x1xf32> to vector<8x8xf32>
    %73 = arith.mulf %68, %72 : vector<8x8xf32>
    %74 = arith.truncf %73 : vector<8x8xf32> to vector<8x8xbf16>
    %cst_23 = arith.constant dense<0.000000e+00> : vector<8x8xf32>
    %75 = tpu.matmul %74, %60, %cst_23 {dimension_numbers = #tpu.dot_dimension_numbers<[1], [0], [0], [1], [0, 0, 1, 1], [], []>} : vector<8x8xbf16>, vector<8x8xbf16>, vector<8x8xf32> -> vector<8x8xf32>
    %76 = tpu.concatenate %21, %39, %57, %75 in 1 : vector<8x8xf32>, vector<8x8xf32>, vector<8x8xf32>, vector<8x8xf32> -> vector<8x32xf32>
    %77 = arith.truncf %76 : vector<8x32xf32> to vector<8x32xbf16>
    %c0_24 = arith.constant 0 : index
    %c0_25 = arith.constant 0 : index
    %78 = vector.load %arg3[%c0_24, %c0_25] : memref<32x32xbf16, #tpu.memory_space<vmem>>, vector<32x32xbf16>
    %cst_26 = arith.constant dense<0.000000e+00> : vector<8x32xf32>
    %79 = tpu.matmul %77, %78, %cst_26 {dimension_numbers = #tpu.dot_dimension_numbers<[1], [0], [0], [1], [0, 0, 1, 1], [], []>} : vector<8x32xbf16>, vector<32x32xbf16>, vector<8x32xf32> -> vector<8x32xf32>
    %c0_27 = arith.constant 0 : index
    %c0_28 = arith.constant 0 : index
    %80 = vector.load %arg4[%c0_27, %c0_28] : memref<1x32xf32, #tpu.memory_space<vmem>>, vector<1x32xf32>
    %81 = vector.broadcast %80 : vector<1x32xf32> to vector<8x32xf32>
    %82 = arith.addf %79, %81 : vector<8x32xf32>
    %83 = arith.addf %82, %3 : vector<8x32xf32>
    %c0_29 = arith.constant 0 : index
    %c0_30 = arith.constant 0 : index
    %c0_31 = arith.constant 0 : index
    %84 = vector.load %arg5[%c0_29, %c0_30, %c0_31] : memref<1x8x32xf32, #tpu.memory_space<vmem>>, vector<1x8x32xf32>
    %85 = vector.shape_cast %84 : vector<1x8x32xf32> to vector<8x32xf32>
    %86 = vector.shape_cast %83 : vector<8x32xf32> to vector<1x8x32xf32>
    tpu.vector_store %arg5[%c0_29, %c0_30, %c0_31], %86 {strides = array<i32>} : memref<1x8x32xf32, #tpu.memory_space<vmem>>, vector<1x8x32xf32>,
    return
  }
  func.func @transform_0(%arg0: i32) -> (i32, i32, i32) {
    %c0_i32 = arith.constant 0 : i32
    %c0_i32_0 = arith.constant 0 : i32
    %c0_i32_1 = arith.constant 0 : i32
    return %arg0, %c0_i32, %c0_i32_0 : i32, i32, i32
  }
  func.func @transform_1(%arg0: i32) -> (i32, i32, i32) {
    %c0_i32 = arith.constant 0 : i32
    %c0_i32_0 = arith.constant 0 : i32
    %c0_i32_1 = arith.constant 0 : i32
    return %arg0, %c0_i32, %c0_i32_0 : i32, i32, i32
  }
  func.func @transform_2(%arg0: i32) -> (i32, i32) {
    %c0_i32 = arith.constant 0 : i32
    %c0_i32_0 = arith.constant 0 : i32
    %c0_i32_1 = arith.constant 0 : i32
    return %c0_i32, %c0_i32_0 : i32, i32
  }
  func.func @transform_3(%arg0: i32) -> (i32, i32) {
    %c0_i32 = arith.constant 0 : i32
    %c0_i32_0 = arith.constant 0 : i32
    %c0_i32_1 = arith.constant 0 : i32
    return %c0_i32, %c0_i32_0 : i32, i32
  }
  func.func @transform_4(%arg0: i32) -> (i32, i32, i32) {
    %c0_i32 = arith.constant 0 : i32
    %c0_i32_0 = arith.constant 0 : i32
    %c0_i32_1 = arith.constant 0 : i32
    return %arg0, %c0_i32, %c0_i32_0 : i32, i32, i32
  }
}

module attributes {stable_mosaic.version = 11 : i64} {
  func.func @_matmul_residual_kernel(%arg0: i32, %arg1: memref<16x128xbf16, #tpu.memory_space<vmem>>, %arg2: memref<128x32xbf16, #tpu.memory_space<vmem>>, %arg3: memref<1x32xf32, #tpu.memory_space<vmem>>, %arg4: memref<16x32xf32, #tpu.memory_space<vmem>>, %arg5: memref<16x32xf32, #tpu.memory_space<vmem>>) attributes {dimension_semantics = [#tpu.dimension_semantics<parallel>], iteration_bounds = array<i64: 1>, scalar_prefetch = 0 : i64, scratch_operands = 0 : i64, tpu.core_type = #tpu.core_type<tc>, window_params = [{transform_indices = @transform_0, window_bounds = array<i64: 16, 128>}, {pipeline_mode = #tpu.pipeline_mode<synchronous>, transform_indices = @transform_1, window_bounds = array<i64: 128, 32>}, {pipeline_mode = #tpu.pipeline_mode<synchronous>, transform_indices = @transform_2, window_bounds = array<i64: 1, 32>}, {transform_indices = @transform_3, window_bounds = array<i64: 16, 32>}, {transform_indices = @transform_4, window_bounds = array<i64: 16, 32>}]} {
    %c0 = arith.constant 0 : index
    %c0_0 = arith.constant 0 : index
    %0 = vector.load %arg1[%c0, %c0_0] : memref<16x128xbf16, #tpu.memory_space<vmem>>, vector<16x128xbf16>
    %c0_1 = arith.constant 0 : index
    %c0_2 = arith.constant 0 : index
    %1 = vector.load %arg2[%c0_1, %c0_2] : memref<128x32xbf16, #tpu.memory_space<vmem>>, vector<128x32xbf16>
    %cst = arith.constant dense<0.000000e+00> : vector<16x32xf32>
    %2 = tpu.matmul %0, %1, %cst {dimension_numbers = #tpu.dot_dimension_numbers<[1], [0], [0], [1], [0, 0, 1, 1], [], []>} : vector<16x128xbf16>, vector<128x32xbf16>, vector<16x32xf32> -> vector<16x32xf32>
    %c0_3 = arith.constant 0 : index
    %c0_4 = arith.constant 0 : index
    %3 = vector.load %arg3[%c0_3, %c0_4] : memref<1x32xf32, #tpu.memory_space<vmem>>, vector<1x32xf32>
    %4 = vector.broadcast %3 : vector<1x32xf32> to vector<16x32xf32>
    %5 = arith.addf %2, %4 : vector<16x32xf32>
    %c0_5 = arith.constant 0 : index
    %c0_6 = arith.constant 0 : index
    %6 = vector.load %arg4[%c0_5, %c0_6] : memref<16x32xf32, #tpu.memory_space<vmem>>, vector<16x32xf32>
    %7 = arith.addf %5, %6 : vector<16x32xf32>
    %c0_7 = arith.constant 0 : index
    %c0_8 = arith.constant 0 : index
    %8 = vector.load %arg5[%c0_7, %c0_8] : memref<16x32xf32, #tpu.memory_space<vmem>>, vector<16x32xf32>
    tpu.vector_store %arg5[%c0_7, %c0_8], %7 {strides = array<i32>} : memref<16x32xf32, #tpu.memory_space<vmem>>, vector<16x32xf32>,
    return
  }
  func.func @transform_0(%arg0: i32) -> (i32, i32) {
    %c0_i32 = arith.constant 0 : i32
    %c0_i32_0 = arith.constant 0 : i32
    return %arg0, %c0_i32 : i32, i32
  }
  func.func @transform_1(%arg0: i32) -> (i32, i32) {
    %c0_i32 = arith.constant 0 : i32
    %c0_i32_0 = arith.constant 0 : i32
    %c0_i32_1 = arith.constant 0 : i32
    return %c0_i32, %c0_i32_0 : i32, i32
  }
  func.func @transform_2(%arg0: i32) -> (i32, i32) {
    %c0_i32 = arith.constant 0 : i32
    %c0_i32_0 = arith.constant 0 : i32
    %c0_i32_1 = arith.constant 0 : i32
    return %c0_i32, %c0_i32_0 : i32, i32
  }
  func.func @transform_3(%arg0: i32) -> (i32, i32) {
    %c0_i32 = arith.constant 0 : i32
    %c0_i32_0 = arith.constant 0 : i32
    return %arg0, %c0_i32 : i32, i32
  }
  func.func @transform_4(%arg0: i32) -> (i32, i32) {
    %c0_i32 = arith.constant 0 : i32
    %c0_i32_0 = arith.constant 0 : i32
    return %arg0, %c0_i32 : i32, i32
  }
}

</mosaic_0001>

<bundles_post_ra>
// kernel: transformer_block.6
= control target key start
LH: loop header
LB: loop body
LE: loop exit
PB: predicated region body
PF: predicated region fallthrough
CT: control target
= control target key end

     0   :  { %vm23_vm0 = vcmask 261120   ;;  %v253_v4 = vmov 32.0   ;;  %s331_s0 = inlined_call_operand.vmem [shape: f32[16,32], index: 0, kind: input, shape index: {}]   ;;  %s332_s1 = inlined_call_operand.vmem [shape: f32[1,32], index: 1, kind: input, shape index: {}]   ;;  %s333_s2 = inlined_call_operand.vmem [shape: f32[1,32], index: 2, kind: input, shape index: {}]   ;;  %s334_s4 = inlined_call_operand.vmem [shape: f32[1,128], index: 4, kind: input, shape index: {}]   ;;  %s335_s3 = inlined_call_operand.vmem [shape: bf16[32,128], index: 3, kind: input, shape index: {}]   ;;  %s336_s5 = inlined_call_operand.vmem [shape: bf16[16,128], index: 5, kind: output, shape index: {}]  }
   0x1   :  { %v21_v0 = vld [vmem:[%s331_s0] sm:$0xff]  ;;  %v22_v2 = vld [vmem:[%s331_s0 + $0x8] sm:$0xff]  ;;  %243 = vrcp.f32 %v253_v4 }
   0x2   :  { %v24_v1 = vsel %vm23_vm0, %v21_v0, 0.0  ;;  %v27_v3 = vsel %vm23_vm0, %v22_v2, 0.0  ;;  %v233_v21 = vld [vmem:[%s335_s3 + $0x8] sm:$0xff]  ;;  %v232_v23 = vld [vmem:[%s335_s3] sm:$0xff] }
   0x3   :  { %25 = vadd.xlane.f32.xlu0 %v24_v1  ;;  %117 = vmatpush.bf16.msra.mxu0 %v233_v21  ;;  %v240_v42 = vld [vmem:[%s332_s1] ss:$0 sm:$0xff] }
   0x4   :  { %v241_v47 = vld [vmem:[%s333_s2] ss:$0 sm:$0xff] }
   0x5   :  { %v242_v52 = vld [vmem:[%s334_s4] ss:$0 sm:$0xff] }
   0x7   :  { %v244_v5 = vpop.eup %243  ;;  %118 = vmatpush.bf16.msra.mxu0 %v232_v23 }
   0x8   :  { %v31_v6 = vmul.f32 32.0, %v244_v5  ;;  %vm35_vm1 = vweird.f32 %v244_v5 }
   0xa   :  { %v32_v7 = vsub.f32 1.0, %v31_v6 }
   0xb   :  { %28 = vadd.xlane.f32.xlu0 %v27_v3 }
   0xc   :  { %v33_v8 = vmul.f32 %v244_v5, %v32_v7 }
   0xe   :  { %v34_v9 = vadd.f32 %v244_v5, %v33_v8 }
  0x10   :  { %v36_v10 = vsel %vm35_vm1, %v244_v5, %v34_v9 }
  0x76   :  { %v26_v11 = vpop.xlane.xlu0 %25 }
  0x77   :  { %v37_v12 = vmul.f32 %v36_v10, %v26_v11 }
  0x79   :  { %v39_v13 = vsub.f32 %v21_v0, %v37_v12 }
  0x7b   :  { %v41_v14 = vmul.f32 %v39_v13, %v39_v13 }
  0x7d   :  { %v43_v15 = vsel %vm23_vm0, %v41_v14, 0.0 }
  0x7e   :  { %44 = vadd.xlane.f32.xlu1 %v43_v15  ;;  %v29_v16 = vpop.xlane.xlu0 %28 }
  0x7f   :  { %v38_v17 = vmul.f32 %v36_v10, %v29_v16 }
  0x81   :  { %v40_v18 = vsub.f32 %v22_v2, %v38_v17 }
  0x83   :  { %v42_v19 = vmul.f32 %v40_v18, %v40_v18 }
  0x85   :  { %v46_v20 = vsel %vm23_vm0, %v42_v19, 0.0 }
  0x86   :  { %47 = vadd.xlane.f32.xlu1 %v46_v20 }
  0xf1   :  { %v45_v22 = vpop.xlane.xlu1 %44 }
  0xf2   :  { %v49_v24 = vmul.f32 %v45_v22, %v36_v10 }
  0xf4   :  { %v51_v25 = vadd.f32 1e-05, %v49_v24 }
  0xf6   :  { %245 = vrsqrt.f32 %v51_v25  ;;  %vm59_vm3 = vweird.f32 %v51_v25 }
  0xf9   :  { %v48_v26 = vpop.xlane.xlu1 %47 }
  0xfa   :  { %v50_v27 = vmul.f32 %v48_v26, %v36_v10 }
  0xfc   :  { %v246_v28 = vpop.eup %245  ;;  %v52_v29 = vadd.f32 1e-05, %v50_v27 }
  0xfd   :  { %v54_v30 = vmul.f32 %v246_v28, %v51_v25  ;;  %vm60_vm2 = vweird.f32 %v246_v28 }
  0xfe   :  { %247 = vrsqrt.f32 %v52_v29  ;;  %vm61_vm4 = vmor %vm59_vm3, %vm60_vm2  ;;  %vm69_vm6 = vweird.f32 %v52_v29 }
  0xff   :  { %v55_v31 = vmul.f32 %v246_v28, %v54_v30 }
 0x101   :  { %v56_v32 = vmul.f32 0.5, %v55_v31 }
 0x103   :  { %v57_v33 = vsub.f32 1.5, %v56_v32 }
 0x104   :  { %v248_v34 = vpop.eup %247 }
 0x105   :  { %v58_v35 = vmul.f32 %v246_v28, %v57_v33  ;;  %v64_v36 = vmul.f32 %v248_v34, %v52_v29  ;;  %vm70_vm5 = vweird.f32 %v248_v34 }
 0x106   :  { %vm71_vm7 = vmor %vm69_vm6, %vm70_vm5 }
 0x107   :  { %v65_v37 = vmul.f32 %v248_v34, %v64_v36  ;;  %v62_v38 = vsel %vm61_vm4, %v246_v28, %v58_v35 }
 0x108   :  { %v73_v41 = vmul.f32 %v62_v38, %v39_v13 }
 0x109   :  { %v66_v39 = vmul.f32 0.5, %v65_v37 }
 0x10a   :  { %v79_v46 = vmul.f32 %v240_v42, %v73_v41 }
 0x10b   :  { %v67_v40 = vsub.f32 1.5, %v66_v39 }
 0x10c   :  { %v85_v49 = vadd.f32 %v241_v47, %v79_v46 }
 0x10d   :  { %v68_v43 = vmul.f32 %v248_v34, %v67_v40 }
 0x10f   :  { %v72_v44 = vsel %vm71_vm7, %v248_v34, %v68_v43 }
 0x110   :  { %v74_v45 = vmul.f32 %v72_v44, %v40_v18 }
 0x112   :  { %v80_v48 = vmul.f32 %v240_v42, %v74_v45 }
 0x114   :  { %v86_v50 = vadd.f32 %v241_v47, %v80_v48 }
 0x116   :  { %v87_v51 = vpack.c.bf16 %v86_v50, %v85_v49 }
 0x118   :  { %229 = vmatmul.msk.bf16.vlgmr.msra.gmra.mxu0 %vm23_vm0, %v87_v51 }
 0x195   :  { %v120_v53 = vpop.f32.mrf.mxu0 }
 0x196   :  { %v310_v54 = vadd.f32 %v242_v52, %v120_v53 }
 0x198   :  { %v313_v55 = vmul.f32 0.70710677, %v310_v54 }
 0x19a   :  { %v129_v56 = vmul.f32 %v313_v55, %v313_v55 }
 0x19c   :  { %v130_v57 = vmin.f32 %v129_v56, 16.0 }
 0x19d   :  { %v122_v58 = vpop.f32.mrf.mxu0 }
 0x19e   :  { %v131_v59 = vmul.f32 2.1237322e-06, %v130_v57  ;;  %v142_v60 = vmul.f32 3.8918573e-05, %v130_v57  ;;  %v317_v61 = vadd.f32 %v242_v52, %v122_v58 }
 0x1a0   :  { %v132_v62 = vadd.f32 0.00028619796, %v131_v59  ;;  %v143_v63 = vadd.f32 0.001143296, %v142_v60  ;;  %v320_v0 = vmul.f32 0.70710677, %v317_v61 }
 0x1a2   :  { %v144_v1 = vmul.f32 %v143_v63, %v130_v57  ;;  %v169_v2 = vmul.f32 %v320_v0, %v320_v0  ;;  %v133_v3 = vmul.f32 %v132_v62, %v130_v57 }
 0x1a4   :  { %v145_v4 = vadd.f32 0.014752088, %v144_v1  ;;  %v170_v5 = vmin.f32 %v169_v2, 16.0  ;;  %v134_v9 = vadd.f32 0.0036580483, %v133_v3 }
 0x1a6   :  { %v146_v6 = vmul.f32 %v145_v4, %v130_v57  ;;  %v171_v7 = vmul.f32 2.1237322e-06, %v170_v5  ;;  %v182_v8 = vmul.f32 3.8918573e-05, %v170_v5  ;;  %v135_v16 = vmul.f32 %v134_v9, %v130_v57 }
 0x1a8   :  { %v147_v10 = vadd.f32 0.112945676, %v146_v6  ;;  %v172_v11 = vadd.f32 0.00028619796, %v171_v7  ;;  %v183_v12 = vadd.f32 0.001143296, %v182_v8 }
 0x1a9   :  { %v136_v22 = vadd.f32 0.05243302, %v135_v16  ;;  %v126_v6 = vmul.f32 0.5, %v317_v61 }
 0x1aa   :  { %v148_v13 = vmul.f32 %v147_v10, %v130_v57  ;;  %v173_v14 = vmul.f32 %v172_v11, %v170_v5  ;;  %v184_v15 = vmul.f32 %v183_v12, %v170_v5 }
 0x1ab   :  { %v137_v27 = vmul.f32 %v136_v22, %v130_v57 }
 0x1ac   :  { %v149_v17 = vadd.f32 0.4994258, %v148_v13  ;;  %v174_v18 = vadd.f32 0.0036580483, %v173_v14  ;;  %v185_v19 = vadd.f32 0.014752088, %v184_v15 }
 0x1ad   :  { %v138_v32 = vadd.f32 0.18741608, %v137_v27 }
 0x1ae   :  { %v150_v20 = vmul.f32 %v149_v17, %v130_v57  ;;  %v186_v21 = vmul.f32 %v185_v19, %v170_v5  ;;  %v175_v24 = vmul.f32 %v174_v18, %v170_v5 }
 0x1af   :  { %v139_v37 = vmul.f32 %v138_v32, %v130_v57 }
 0x1b0   :  { %v151_v23 = vadd.f32 1.0, %v150_v20  ;;  %v187_v25 = vadd.f32 0.112945676, %v186_v21  ;;  %v176_v28 = vadd.f32 0.05243302, %v175_v24 }
 0x1b1   :  { %v140_v43 = vadd.f32 1.1283791, %v139_v37 }
 0x1b2   :  { %249 = vrcp.f32 %v151_v23  ;;  %v188_v26 = vmul.f32 %v187_v25, %v170_v5  ;;  %v177_v34 = vmul.f32 %v176_v28, %v170_v5  ;;  %v163_v39 = vand.u32 2147483648, %v151_v23 }
 0x1b3   :  { %v161_v41 = vand.u32 2147483647, %v151_v23  ;;  %vm157_vm9 = vweird.f32 %v151_v23  ;;  %v141_v50 = vmul.f32 %v140_v43, %v313_v55 }
 0x1b4   :  { %v189_v29 = vadd.f32 0.4994258, %v188_v26  ;;  %v178_v40 = vadd.f32 0.18741608, %v177_v34  ;;  %v164_v46 = vor.u32 1.1754944e-38, %v163_v39 }
 0x1b5   :  { %vm162_vm11 = vcmp.eq.f32.partialorder %v161_v41, 8.507059e+37 }
 0x1b6   :  { %v190_v30 = vmul.f32 %v189_v29, %v170_v5  ;;  %v179_v47 = vmul.f32 %v178_v40, %v170_v5  ;;  %v125_v5 = vmul.f32 0.5, %v310_v54 }
 0x1b8   :  { %v250_v31 = vpop.eup %249  ;;  %v191_v35 = vadd.f32 1.0, %v190_v30  ;;  %v180_v52 = vadd.f32 1.1283791, %v179_v47 }
 0x1b9   :  { %v153_v33 = vmul.f32 %v250_v31, %v151_v23  ;;  %vm158_vm8 = vweird.f32 %v250_v31 }
 0x1ba   :  { %251 = vrcp.f32 %v191_v35  ;;  %vm159_vm10 = vmor %vm157_vm9, %vm158_vm8  ;;  %v203_v53 = vand.u32 2147483648, %v191_v35  ;;  %v201_v58 = vand.u32 2147483647, %v191_v35  ;;  %vm197_vm13 = vweird.f32 %v191_v35 }
 0x1bb   :  { %v154_v36 = vsub.f32 1.0, %v153_v33  ;;  %v181_v63 = vmul.f32 %v180_v52, %v320_v0 }
 0x1bc   :  { %v204_v60 = vor.u32 1.1754944e-38, %v203_v53  ;;  %vm202_vm15 = vcmp.eq.f32.partialorder %v201_v58, 8.507059e+37 }
 0x1bd   :  { %v155_v38 = vmul.f32 %v250_v31, %v154_v36 }
 0x1bf   :  { %v156_v42 = vadd.f32 %v250_v31, %v155_v38 }
 0x1c0   :  { %v252_v44 = vpop.eup %251 }
 0x1c1   :  { %v160_v45 = vsel %vm159_vm10, %v250_v31, %v156_v42  ;;  %v193_v48 = vmul.f32 %v252_v44, %v191_v35  ;;  %vm198_vm12 = vweird.f32 %v252_v44 }
 0x1c2   :  { %v165_v49 = vsel %vm162_vm11, %v164_v46, %v160_v45  ;;  %vm199_vm14 = vmor %vm197_vm13, %vm198_vm12 }
 0x1c3   :  { %v194_v51 = vsub.f32 1.0, %v193_v48  ;;  %v166_v56 = vmul.f32 %v165_v49, %v141_v50 }
 0x1c5   :  { %v195_v57 = vmul.f32 %v252_v44, %v194_v51  ;;  %v230_v62 = vclamps-f32 %v166_v56, 1.0 }
 0x1c7   :  { %v196_v59 = vadd.f32 %v252_v44, %v195_v57  ;;  %v209_v4 = vadd.f32 1.0, %v230_v62 }
 0x1c9   :  { %v200_v1 = vsel %vm199_vm14, %v252_v44, %v196_v59  ;;  %v211_v8 = vmul.f32 %v209_v4, %v125_v5 }
 0x1ca   :  { %v205_v2 = vsel %vm202_vm15, %v204_v60, %v200_v1 }
 0x1cb   :  { %v206_v3 = vmul.f32 %v205_v2, %v181_v63 }
 0x1cd   :  { %v231_v55 = vclamps-f32 %v206_v3, 1.0 }
 0x1cf   :  { %v210_v7 = vadd.f32 1.0, %v231_v55 }
 0x1d1   :  { %v212_v9 = vmul.f32 %v210_v7, %v126_v6 }
 0x1d3   :  { %v237_v10 = vpack.c.bf16 %v212_v9, %v211_v8 }
 0x1d5   :  { %238 = vst [vmem:[%s336_s5] sm:$0xff] %v237_v10  }

// kernel: transformer_block.7
= control target key start
LH: loop header
LB: loop body
LE: loop exit
PB: predicated region body
PF: predicated region fallthrough
CT: control target
= control target key end

     0   :  { %s275_s0 = inlined_call_operand.vmem [shape: bf16[16,128], index: 0, kind: input, shape index: {}]   ;;  %s276_s1 = inlined_call_operand.vmem [shape: bf16[128,32], index: 1, kind: input, shape index: {}]   ;;  %s277_s2 = inlined_call_operand.vmem [shape: f32[1,32], index: 2, kind: input, shape index: {}]   ;;  %s278_s3 = inlined_call_operand.vmem [shape: f32[16,32], index: 3, kind: input, shape index: {}]   ;;  %s279_s4 = inlined_call_operand.hbm [shape: f32[16,32], index: 4, kind: output, shape index: {}]  }
   0x1   :  { %v177_v0 = vld [vmem:[%s276_s1 + $0x38] sm:$0xff]  ;;  %v176_v1 = vld [vmem:[%s276_s1 + $0x30] sm:$0xff] }
   0x2   :  { %94 = vmatpush.bf16.msra.mxu0 %v177_v0 }
   0x3   :  { %9 = vsyncpa [#allocation3], 0  ;;  %v175_v2 = vld [vmem:[%s276_s1 + $0x28] sm:$0xff]  ;;  %v174_v3 = vld [vmem:[%s276_s1 + $0x20] sm:$0xff]  ;;  %vm112_vm0 = vcmask 261120   ;;  %s210_s16 = smov 8  }
   0x4   :  { %v173_v4 = vld [vmem:[%s276_s1 + $0x18] sm:$0xff]  ;;  %v172_v5 = vld [vmem:[%s276_s1 + $0x10] sm:$0xff]  ;;  %v171_v6 = vld [vmem:[%s276_s1 + $0x8] sm:$0xff] }
   0x5   :  { %v170_v7 = vld [vmem:[%s276_s1] sm:$0xff]  ;;  %s208_s1 = smov [#allocation2]   ;;  %v109_v15 = vld [vmem:[%s278_s3 + $0x8] sm:$0xff] }
   0x6   :  { %95 = vmatpush.bf16.msra.mxu0 %v176_v1  ;;  %v169_v8 = vld [vmem:[%s275_s0] sm:$0xff]  ;;  %s119_s11 = sshll.u32 %s208_s1, 4  ;;  %s121_s0 = sshll.u32 %s279_s4, 4  ;;  %s120_s11 = int_to_ptr.vmem [resolvable:$true] %s119_s11  ;;  %s122_s0 = int_to_ptr.hbm [resolvable:$true] %s121_s0 }
   0x7   :  { %v181_v9 = vld [vmem:[%s277_s2] ss:$0 sm:$0xff]  ;;  %s209_s2 = smov 128  }
   0x8   :  { %v108_v11 = vld [vmem:[%s278_s3] sm:$0xff] }
   0xa   :  { %96 = vmatpush.bf16.msra.mxu0 %v175_v2 }
   0xe   :  { %97 = vmatpush.bf16.msra.mxu0 %v174_v3 }
  0x12   :  { %98 = vmatpush.bf16.msra.mxu0 %v173_v4 }
  0x16   :  { %99 = vmatpush.bf16.msra.mxu0 %v172_v5 }
  0x1a   :  { %100 = vmatpush.bf16.msra.mxu0 %v171_v6 }
  0x1e   :  { %101 = vmatpush.bf16.msra.mxu0 %v170_v7 }
  0x21   :  { %102 = vmatmul.bf16.vlgmr.msra.gmra.mxu0 %v169_v8 }
  0x9e   :  { %v103_v10 = vpop.f32.mrf.mxu0 }
  0x9f   :  { %v104_v12 = vadd.f32 %v181_v9, %v103_v10 }
  0xa1   :  { %v110_v13 = vadd.f32 %v108_v11, %v104_v12 }
  0xa3   :  { %113 = vst.msk [vmem:[#allocation2] sm:$0xff] %vm112_vm0, %v110_v13 }
  0xa6   :  { %v105_v14 = vpop.f32.mrf.mxu0 }
  0xa7   :  { %v106_v16 = vadd.f32 %v181_v9, %v105_v14 }
  0xa9   :  { %v111_v17 = vadd.f32 %v109_v15, %v106_v16 }
  0xab   :  { %114 = vst.msk [vmem:[#allocation2 + $0x8] sm:$0xff] %vm112_vm0, %v111_v17 }
  0xac   :  { %127 = dma.vmem_to_hbm [thread:$0]  %s120_s11, 256, %s122_s0, [#allocation3], %s209_s2, %s209_s2, %s210_s16  }
  0xad   :  { %206 = dma.done.wait [#allocation3], 256  }
  0xae   :  { %207 = vsyncadd [#allocation3], 4294967040 }
  0xaf   :  { %132 = vsyncpa [#allocation3], 1 }

// kernel: transformer_block.4
= control target key start
LH: loop header
LB: loop body
LE: loop exit
PB: predicated region body
PF: predicated region fallthrough
CT: control target
= control target key end

     0   :  { %10 = vsyncpa [#allocation3], 0  ;;  %s350_s0 = inlined_call_operand.hbm [shape: f32[16,32], index: 0, kind: input, shape index: {}]   ;;  %s351_s1 = inlined_call_operand.vmem [shape: f32[1,32], index: 1, kind: input, shape index: {}]   ;;  %s352_s2 = inlined_call_operand.vmem [shape: f32[1,32], index: 2, kind: input, shape index: {}]   ;;  %s353_s3 = inlined_call_operand.hbm [shape: bf16[32,128], index: 3, kind: input, shape index: {}]   ;;  %s354_s4 = inlined_call_operand.hbm [shape: f32[1,128], index: 4, kind: input, shape index: {}]   ;;  %s355_s5 = inlined_call_operand.vmem [shape: bf16[16,128], index: 5, kind: output, shape index: {}]  }
   0x1   :  { %11 = vsyncpa [#allocation5], 0  ;;  %s33_s20 = sshll.u32 %s353_s3, 4  ;;  %s289_s21 = smov [#allocation4]   ;;  %s34_s20 = int_to_ptr.hbm [resolvable:$true] %s33_s20 }
   0x2   :  { %s35_s22 = sshll.u32 %s289_s21, 4  ;;  %s16_s25 = sshll.u32 %s350_s0, 4  ;;  %s36_s22 = int_to_ptr.vmem [resolvable:$true] %s35_s22  ;;  %s17_s25 = int_to_ptr.hbm [resolvable:$true] %s16_s25 }
   0x3   :  { %s290_s26 = smov 64   ;;  %s291_s27 = smov 4  }
   0x4   :  { %41 = dma.hbm_to_vmem [thread:$0]  %s34_s20, 256, %s36_s22, [#allocation5], %s290_s26, %s290_s26, %s291_s27  }
   0x5   :  { %s292_s28 = smov [#allocation2]   ;;  %s293_s30 = smov 128  }
   0x6   :  { %s18_s29 = sshll.u32 %s292_s28, 4  ;;  %s294_s6 = smov 8   ;;  %s19_s29 = int_to_ptr.vmem [resolvable:$true] %s18_s29 }
   0x7   :  { %24 = dma.hbm_to_vmem [thread:$0]  %s17_s25, 256, %s19_s29, [#allocation3], %s293_s30, %s293_s30, %s294_s6  }
   0x8   :  { %s47_s8 = sshll.u32 %s354_s4, 4  ;;  %s295_s9 = smov [#allocation6]   ;;  %s48_s8 = int_to_ptr.hbm [resolvable:$true] %s47_s8 }
   0x9   :  { %s49_s10 = sshll.u32 %s295_s9, 4  ;;  %s50_s10 = int_to_ptr.vmem [resolvable:$true] %s49_s10 }
   0xa   :  { %52 = dma.hbm_to_vmem [thread:$0]  %s48_s8, 16, %s50_s10, [#allocation5]  }
   0xb   :  { %285 = dma.done.wait [#allocation3], 256  }
   0xc   :  { %286 = vsyncadd [#allocation3], 4294967040 }
   0xd   :  { %287 = dma.done.wait [#allocation5], 272  }
   0xe   :  { %288 = vsyncadd [#allocation5], 4294967024  ;;  %vm68_vm0 = vcmask 261120   ;;  %v66_v0 = vld [vmem:[#allocation2] sm:$0xff]  ;;  %v67_v2 = vld [vmem:[#allocation2 + $0x8] sm:$0xff]  ;;  %v296_v4 = vmov 32.0  }
   0xf   :  { %v69_v1 = vsel %vm68_vm0, %v66_v0, 0.0  ;;  %v72_v3 = vsel %vm68_vm0, %v67_v2, 0.0  ;;  %207 = vrcp.f32 %v296_v4  ;;  %v190_v21 = vld [vmem:[#allocation4 + $0x8] sm:$0xff]  ;;  %v189_v23 = vld [vmem:[#allocation4] sm:$0xff]  ;;  %v204_v42 = vld [vmem:[%s351_s1] ss:$0 sm:$0xff] }
  0x10   :  { %70 = vadd.xlane.f32.xlu0 %v69_v1  ;;  %162 = vmatpush.bf16.msra.mxu0 %v190_v21  ;;  %v205_v47 = vld [vmem:[%s352_s2] ss:$0 sm:$0xff] }
  0x11   :  { %v206_v53 = vld [vmem:[#allocation6] ss:$0 sm:$0xff] }
  0x14   :  { %163 = vmatpush.bf16.msra.mxu0 %v189_v23 }
  0x15   :  { %v208_v5 = vpop.eup %207 }
  0x16   :  { %v76_v6 = vmul.f32 32.0, %v208_v5  ;;  %vm80_vm1 = vweird.f32 %v208_v5 }
  0x18   :  { %73 = vadd.xlane.f32.xlu0 %v72_v3  ;;  %v77_v7 = vsub.f32 1.0, %v76_v6 }
  0x1a   :  { %v78_v8 = vmul.f32 %v208_v5, %v77_v7 }
  0x1c   :  { %v79_v9 = vadd.f32 %v208_v5, %v78_v8 }
  0x1e   :  { %v81_v10 = vsel %vm80_vm1, %v208_v5, %v79_v9 }
  0x83   :  { %v71_v11 = vpop.xlane.xlu0 %70 }
  0x84   :  { %v82_v12 = vmul.f32 %v81_v10, %v71_v11 }
  0x86   :  { %v84_v13 = vsub.f32 %v66_v0, %v82_v12 }
  0x88   :  { %v86_v14 = vmul.f32 %v84_v13, %v84_v13 }
  0x8a   :  { %v88_v15 = vsel %vm68_vm0, %v86_v14, 0.0 }
  0x8b   :  { %89 = vadd.xlane.f32.xlu1 %v88_v15  ;;  %v74_v16 = vpop.xlane.xlu0 %73 }
  0x8c   :  { %v83_v17 = vmul.f32 %v81_v10, %v74_v16 }
  0x8e   :  { %v85_v18 = vsub.f32 %v67_v2, %v83_v17 }
  0x90   :  { %v87_v19 = vmul.f32 %v85_v18, %v85_v18 }
  0x92   :  { %v91_v20 = vsel %vm68_vm0, %v87_v19, 0.0 }
  0x93   :  { %92 = vadd.xlane.f32.xlu1 %v91_v20 }
  0xfe   :  { %v90_v22 = vpop.xlane.xlu1 %89 }
  0xff   :  { %v94_v24 = vmul.f32 %v90_v22, %v81_v10 }
 0x101   :  { %v96_v25 = vadd.f32 1e-05, %v94_v24 }
 0x103   :  { %209 = vrsqrt.f32 %v96_v25  ;;  %vm104_vm3 = vweird.f32 %v96_v25 }
 0x106   :  { %v93_v26 = vpop.xlane.xlu1 %92 }
 0x107   :  { %v95_v27 = vmul.f32 %v93_v26, %v81_v10 }
 0x109   :  { %v210_v28 = vpop.eup %209  ;;  %v97_v29 = vadd.f32 1e-05, %v95_v27 }
 0x10a   :  { %v99_v30 = vmul.f32 %v210_v28, %v96_v25  ;;  %vm105_vm2 = vweird.f32 %v210_v28 }
 0x10b   :  { %211 = vrsqrt.f32 %v97_v29  ;;  %vm106_vm4 = vmor %vm104_vm3, %vm105_vm2  ;;  %vm114_vm6 = vweird.f32 %v97_v29 }
 0x10c   :  { %v100_v31 = vmul.f32 %v210_v28, %v99_v30 }
 0x10e   :  { %v101_v32 = vmul.f32 0.5, %v100_v31 }
 0x110   :  { %v102_v33 = vsub.f32 1.5, %v101_v32 }
 0x111   :  { %v212_v34 = vpop.eup %211 }
 0x112   :  { %v103_v35 = vmul.f32 %v210_v28, %v102_v33  ;;  %v109_v36 = vmul.f32 %v212_v34, %v97_v29  ;;  %vm115_vm5 = vweird.f32 %v212_v34 }
 0x113   :  { %vm116_vm7 = vmor %vm114_vm6, %vm115_vm5 }
 0x114   :  { %v110_v37 = vmul.f32 %v212_v34, %v109_v36  ;;  %v107_v38 = vsel %vm106_vm4, %v210_v28, %v103_v35 }
 0x115   :  { %v118_v41 = vmul.f32 %v107_v38, %v84_v13 }
 0x116   :  { %v111_v39 = vmul.f32 0.5, %v110_v37 }
 0x117   :  { %v124_v46 = vmul.f32 %v204_v42, %v118_v41 }
 0x118   :  { %v112_v40 = vsub.f32 1.5, %v111_v39 }
 0x119   :  { %v130_v49 = vadd.f32 %v205_v47, %v124_v46 }
 0x11a   :  { %v113_v43 = vmul.f32 %v212_v34, %v112_v40 }
 0x11c   :  { %v117_v44 = vsel %vm116_vm7, %v212_v34, %v113_v43 }
 0x11d   :  { %v119_v45 = vmul.f32 %v117_v44, %v85_v18 }
 0x11f   :  { %v125_v48 = vmul.f32 %v204_v42, %v119_v45 }
 0x121   :  { %v131_v50 = vadd.f32 %v205_v47, %v125_v48 }
 0x123   :  { %v132_v51 = vpack.c.bf16 %v131_v50, %v130_v49 }
 0x125   :  { %188 = vmatmul.msk.bf16.vlgmr.msra.gmra.mxu0 %vm68_vm0, %v132_v51 }
 0x1a2   :  { %v165_v52 = vpop.f32.mrf.mxu0 }
 0x1a3   :  { %v166_v55 = vadd.f32 %v206_v53, %v165_v52 }
 0x1aa   :  { %v167_v54 = vpop.f32.mrf.mxu0 }
 0x1ab   :  { %v168_v56 = vadd.f32 %v206_v53, %v167_v54 }
 0x1ad   :  { %v194_v57 = vpack.c.bf16 %v168_v56, %v166_v55 }
 0x1af   :  { %195 = vst [vmem:[%s355_s5] sm:$0xff] %v194_v57  }
 0x1b0   :  { %178 = vsyncpa [#allocation3], 1 }
 0x1b1   :  { %179 = vsyncpa [#allocation5], 1 }

// kernel: transformer_block.5
= control target key start
LH: loop header
LB: loop body
LE: loop exit
PB: predicated region body
PF: predicated region fallthrough
CT: control target
= control target key end

     0   :  { %s681_s15 = smov 0   ;;  %s755_s0 = inlined_call_operand.vmem [shape: bf16[2,8,128], index: 0, kind: input, shape index: {}]   ;;  %s756_s1 = inlined_call_operand.vmem [shape: f32[2,8,32], index: 1, kind: input, shape index: {}]   ;;  %s757_s2 = inlined_call_operand.vmem [shape: bf16[32,32], index: 2, kind: input, shape index: {}]   ;;  %s758_s3 = inlined_call_operand.vmem [shape: f32[1,32], index: 3, kind: input, shape index: {}]   ;;  %s759_s4 = inlined_call_operand.vmem [shape: f32[2,8,32], index: 4, kind: output, shape index: {}]  }
   0x1 LB: > { %s566_s16 = sadd.s32 4294967295, %s640_s15   ;;  %p570_p0 = scmp.ge.s32.totalorder %s640_s15, 1  ;;  %s640_s15 = sphi %s681_s15, %s14_s15  }
   0x2   : > { %p170_p1 = scmp.lt.s32.totalorder %s640_s15, 3 }
   0x4   : > { %p171_p2 = pnand %p570_p0, %p170_p1 }
   0x5   : > { %p198_p3 = scmp.lt.s32.totalorder (!%p171_p2), %s566_s16, 1  ;;  %s642_s21 = smov (!%p171_p2), 96  }
   0x6   : > { %174 = sbr.rel (%p171_p2) target bundleno = 1330 (0x532), region = 36  ;;  %s643_s22 = smov (!%p171_p2), 88  }
   0x7   : > { %s644_s23 = smov (!%p171_p2), 120   ;;  %s645_s24 = smov (!%p171_p2), 64  }
   0x8   : > { %s646_s25 = smov (!%p171_p2), 80   ;;  %s647_s26 = smov (!%p171_p2), 72  }
   0x9   : > { %s648_s27 = smov (!%p171_p2), 112   ;;  %s649_s28 = smov (!%p171_p2), 104  }
   0xa   : > { %s650_s29 = smov (!%p171_p2), 56   ;;  %s651_s30 = smov (!%p171_p2), 40  }
   0xb   : > { %s761_s16 = smov (!%p198_p3, %s566_s16), 1  ;;  %vm218_vm0 = vcmask 64512   ;;  %vm256_vm1 = vcmask 1043456   ;;  %s652_s5 = smov 48   ;;  %vm457_vm2 = vcmask 130048   ;;  %vm459_vm3 = vcmask 195584  }
   0xc   : > { %s571_s17 = sshll.u32 %s761_s16, 2  ;;  %s653_s6 = smov 8   ;;  %vm482_vm4 = vcmask 261120  }
   0xd   : > { %s201_s20 = scalar_lea.vmem %s755_s0, %s571_s17  ;;  %s654_s7 = smov 16  }
   0xe   : > { %v211_v0 = vld [vmem:[%s201_s20] sm:$0xf]  ;;  %s655_s8 = smov 24   ;;  %s572_s13 = sshll.u32 %s761_s16, 3 }
   0xf   : > { %v214_v1 = vunpack.c.l.b16 %v211_v0  ;;  %s205_s18 = scalar_lea.vmem %s756_s1, %s572_s13 }
  0x11   : > { %v695_v2 = vpack.c.b16 %v214_v1, %v214_v1 }
  0x13   : > { %216 = vrot.lane.b32.xlu0 %v695_v2, %s642_s21  ;;  %275 = vrot.lane.b32.xlu1 %v695_v2, %s643_s22 }
  0x14   : > { %273 = vrot.lane.b32.xlu2 %v695_v2, %s644_s23  ;;  %s209_s23 = scalar_lea.vmem %s759_s4, %s572_s13 }
  0x1c   : > { %251 = vrot.lane.b32.xlu2 %v695_v2, %s645_s24 }
  0x24   : > { %332 = vrot.lane.b32.xlu2 %v695_v2, %s646_s25 }
  0x2c   : > { %389 = vrot.lane.b32.xlu2 %v695_v2, %s647_s26 }
  0x34   : > { %330 = vrot.lane.b32.xlu2 %v695_v2, %s648_s27 }
  0x3c   : > { %387 = vrot.lane.b32.xlu2 %v695_v2, %s649_s28 }
  0x6e   : > { %v274_v7 = vpop.permute.xlu2 %273 }
  0x76   : > { %v252_v12 = vpop.permute.xlu2 %251 }
  0x77   : > { %v258_v17 = vsel %vm256_vm1, %v252_v12, 0 }
  0x78   : > { %267 = vmatpush.bf16.msra.mxu1 %v258_v17 }
  0x7e   : > { %v333_v13 = vpop.permute.xlu2 %332 }
  0x7f   : > { %v338_v15 = vsel %vm218_vm0, %v333_v13, 0 }
  0x80   : > { %347 = vmatpush.bf16.xpose.msrb.mxu1 %v338_v15 }
  0x85   : > { %v217_v3 = vpop.permute.xlu0 %216  ;;  %v276_v5 = vpop.permute.xlu1 %275 }
  0x86   : > { %v223_v4 = vsel %vm218_vm0, %v217_v3, 0  ;;  %v281_v6 = vsel %vm218_vm0, %v276_v5, 0  ;;  %v390_v14 = vpop.permute.xlu2 %389 }
  0x87   : > { %232 = vmatpush.bf16.xpose.msra.mxu0 %v223_v4  ;;  %290 = vmatpush.bf16.xpose.msra.mxu2 %v281_v6  ;;  %v395_v16 = vsel %vm218_vm0, %v390_v14, 0 }
  0x8e   : > { %574 = vmatmul.msk.bf16.vlgmr.msra.gmra.mxu0 %vm218_vm0, %v211_v0  ;;  %576 = vmatmul.msk.bf16.vlgmr.msra.gmra.mxu2 %vm218_vm0, %v274_v7  ;;  %v331_v18 = vpop.permute.xlu2 %330 }
  0x8f   : > { %404 = vmatpush.bf16.xpose.msrb.mxu0 %v395_v16 }
  0x96   : > { %v388_v19 = vpop.permute.xlu2 %387 }
  0x9e   : > { %580 = vmatmul.msk.bf16.vlgmr.msrb.gmra.mxu0 %vm218_vm0, %v388_v19  ;;  %v593_v19 = vld [vmem:[%s757_s2] sm:$0xff] }
 0x10b   : > { %v234_v8 = vpop.f32.mrf.mxu0 }
 0x10c   : > { %v238_v9 = vmul.f32 0.17677669, %v234_v8 }
 0x10e   : > { %v239_v10 = vsel %vm218_vm0, %v238_v9, -inf }
 0x10f   : > { %240 = vmax.xlane.f32.xlu0 %v239_v10 }
 0x111   : > { %v292_v20 = vpop.f32.mrf.mxu2 }
 0x112   : > { %v296_v21 = vmul.f32 0.17677669, %v292_v20 }
 0x113   : > { %v236_v11 = vpop.f32.mrf.mxu0 }
 0x114   : > { %v297_v23 = vsel %vm218_vm0, %v296_v21, -inf }
 0x115   : > { %298 = vmax.xlane.f32.xlu2 %v297_v23 }
 0x119   : > { %v294_v26 = vpop.f32.mrf.mxu2 }
 0x11b   : > { %v406_v29 = vpop.f32.mrf.mxu0 }
 0x11c   : > { %v410_v30 = vmul.f32 0.17677669, %v406_v29 }
 0x11e   : > { %v411_v31 = vsel %vm218_vm0, %v410_v30, -inf }
 0x123   : > { %v408_v33 = vpop.f32.mrf.mxu0 }
 0x182   : > { %v241_v22 = vpop.xlane.xlu0 %240 }
 0x183   : > { %v242_v24 = vsub.f32 %v238_v9, %v241_v22 }
 0x185   : > { %v243_v25 = vmul.f32 1.442695, %v242_v24 }
 0x187   : > { %618 = vpow2.f32 %v243_v25 }
 0x188   : > { %v299_v38 = vpop.xlane.xlu2 %298 }
 0x189   : > { %v300_v40 = vsub.f32 %v296_v21, %v299_v38 }
 0x18b   : > { %v301_v41 = vmul.f32 1.442695, %v300_v40 }
 0x18d   : > { %v619_v27 = vpop.eup %618 }
 0x18e   : > { %v245_v28 = vsel %vm218_vm0, %v619_v27, 0.0 }
 0x18f   : > { %246 = vadd.xlane.f32.xlu1 %v245_v28  ;;  %v212_v28 = vld [vmem:[%s205_s18] sm:$0xff] }
 0x197   : > { %412 = vmax.xlane.f32.xlu1 %v411_v31 }
 0x1b0   : > { %309 = vrot.lane.b32.xlu1 %v695_v2, %s650_s29 }
 0x1b8   : > { %423 = vrot.lane.b32.xlu1 %v695_v2, %s651_s30 }
 0x202   : > { %v247_v32 = vpop.xlane.xlu1 %246 }
 0x203   : > { %620 = vrcp.f32 %v247_v32 }
 0x204   : > { %622 = vpow2.f32 %v301_v41 }
 0x209   : > { %v621_v34 = vpop.eup %620 }
 0x20a   : > { %v249_v35 = vmul.f32 %v621_v34, %v619_v27  ;;  %v413_v42 = vpop.xlane.xlu1 %412  ;;  %v623_v48 = vpop.eup %622  ;;  %v617_v27 = vld [vmem:[%s758_s3] ss:$0 sm:$0xff] }
 0x20b   : > { %v414_v45 = vsub.f32 %v410_v30, %v413_v42  ;;  %v303_v50 = vsel %vm218_vm0, %v623_v48, 0.0 }
 0x20c   : > { %v250_v36 = vpack.c.bf16 %v249_v35, %v249_v35 }
 0x20d   : > { %v415_v47 = vmul.f32 1.442695, %v414_v45 }
 0x20e   : > { %575 = vmatmul.msk.bf16.vlgmr.msra.gmra.mxu1 %vm218_vm0, %v250_v36 }
 0x20f   : > { %624 = vpow2.f32 %v415_v47 }
 0x215   : > { %v625_v51 = vpop.eup %624 }
 0x216   : > { %v417_v52 = vsel %vm218_vm0, %v625_v51, 0.0 }
 0x21e   : > { %578 = vmatmul.msk.bf16.vlgmr.msrb.gmra.mxu1 %vm218_vm0, %v331_v18  ;;  %v594_v18 = vld [vmem:[%s757_s2 + $0x8] sm:$0xff] }
 0x21f   : > { %492 = vmatpush.bf16.msra.mxu1 %v594_v18 }
 0x222   : > { %v310_v53 = vpop.permute.xlu1 %309 }
 0x223   : > { %v315_v54 = vsel %vm256_vm1, %v310_v53, 0  ;;  %493 = vmatpush.bf16.msra.mxu1 %v593_v19 }
 0x224   : > { %324 = vmatpush.bf16.msra.mxu3 %v315_v54 }
 0x22a   : > { %v424_v55 = vpop.permute.xlu1 %423 }
 0x22b   : > { %v429_v56 = vsel %vm256_vm1, %v424_v55, 0 }
 0x22c   : > { %438 = vmatpush.bf16.msrb.mxu2 %v429_v56 }
 0x28b   : > { %v721_v37 = vpop.f32.mrf.mxu1 }
 0x293   : > { %v271_v39 = vpop.f32.mrf.mxu1 }
 0x29b   : > { %v349_v43 = vpop.f32.mrf.mxu1 }
 0x29c   : > { %v353_v44 = vmul.f32 0.17677669, %v349_v43 }
 0x29e   : > { %v354_v46 = vsel %vm218_vm0, %v353_v44, -inf }
 0x29f   : > { %355 = vmax.xlane.f32.xlu0 %v354_v46 }
 0x2a3   : > { %v351_v49 = vpop.f32.mrf.mxu1 }
 0x2a7   : > { %304 = vadd.xlane.f32.xlu0 %v303_v50 }
 0x2af   : > { %418 = vadd.xlane.f32.xlu0 %v417_v52 }
 0x312   : > { %v356_v57 = vpop.xlane.xlu0 %355 }
 0x313   : > { %v357_v58 = vsub.f32 %v353_v44, %v356_v57 }
 0x315   : > { %v358_v59 = vmul.f32 1.442695, %v357_v58 }
 0x317   : > { %626 = vpow2.f32 %v358_v59 }
 0x31a   : > { %v305_v60 = vpop.xlane.xlu0 %304 }
 0x31b   : > { %628 = vrcp.f32 %v305_v60 }
 0x31d   : > { %v627_v61 = vpop.eup %626 }
 0x31e   : > { %v360_v62 = vsel %vm218_vm0, %v627_v61, 0.0 }
 0x31f   : > { %361 = vadd.xlane.f32.xlu0 %v360_v62 }
 0x321   : > { %v629_v63 = vpop.eup %628 }
 0x322   : > { %v419_v0 = vpop.xlane.xlu0 %418  ;;  %v307_v1 = vmul.f32 %v629_v63, %v623_v48 }
 0x323   : > { %630 = vrcp.f32 %v419_v0 }
 0x324   : > { %v308_v3 = vpack.c.bf16 %v307_v1, %v307_v1 }
 0x326   : > { %577 = vmatmul.msk.bf16.vlgmr.msra.gmra.mxu3 %vm218_vm0, %v308_v3 }
 0x329   : > { %v631_v4 = vpop.eup %630 }
 0x32a   : > { %v421_v5 = vmul.f32 %v631_v4, %v625_v51 }
 0x32c   : > { %v422_v6 = vpack.c.bf16 %v421_v5, %v421_v5 }
 0x32e   : > { %581 = vmatmul.msk.bf16.vlgmr.msrb.gmra.mxu2 %vm218_vm0, %v422_v6 }
 0x333   : > { %366 = vrot.lane.b32.xlu0 %v695_v2, %s652_s5 }
 0x392   : > { %v362_v7 = vpop.xlane.xlu0 %361 }
 0x393   : > { %632 = vrcp.f32 %v362_v7 }
 0x399   : > { %v633_v8 = vpop.eup %632 }
 0x39a   : > { %v364_v9 = vmul.f32 %v633_v8, %v627_v61 }
 0x39c   : > { %v365_v12 = vpack.c.bf16 %v364_v9, %v364_v9 }
 0x3a5   : > { %v367_v10 = vpop.permute.xlu0 %366 }
 0x3a6   : > { %v372_v11 = vsel %vm256_vm1, %v367_v10, 0 }
 0x3a7   : > { %381 = vmatpush.bf16.msrb.mxu3 %v372_v11 }
 0x3a9   : > { %v326_v13 = vpop.f32.mrf.mxu3 }
 0x3aa   : > { %579 = vmatmul.msk.bf16.vlgmr.msrb.gmra.mxu3 %vm218_vm0, %v365_v12  ;;  %445 = vrot.lane.b32.xlu2 %v326_v13, %s653_s6 }
 0x3b1   : > { %v328_v14 = vpop.f32.mrf.mxu3  ;;  %v440_v15 = vpop.f32.mrf.mxu2 }
 0x3b9   : > { %v442_v16 = vpop.f32.mrf.mxu2 }
 0x404   : > { %v446_v21 = vpop.permute.xlu2 %445 }
 0x405   : > { %v456_v22 = vsel %vm218_vm0, %v721_v37, %v446_v21 }
 0x42d   : > { %v383_v17 = vpop.f32.mrf.mxu3 }
 0x42e   : > { %449 = vrot.lane.b32.xlu1 %v383_v17, %s654_s7 }
 0x435   : > { %v385_v2 = vpop.f32.mrf.mxu3 }
 0x436   : > { %453 = vrot.lane.b32.xlu1 %v440_v15, %s655_s8 }
 0x4a0   : > { %v450_v20 = vpop.permute.xlu1 %449 }
 0x4a1   : > { %v458_v23 = vsel %vm457_vm2, %v456_v22, %v450_v20 }
 0x4a8   : > { %v454_v24 = vpop.permute.xlu1 %453 }
 0x4a9   : > { %v460_v25 = vsel %vm459_vm3, %v458_v23, %v454_v24 }
 0x4aa   : > { %v461_v26 = vpack.c.bf16 %v460_v25, %v460_v25 }
 0x4ac   : > { %590 = vmatmul.msk.bf16.vlgmr.msra.gmra.mxu1 %vm482_vm4, %v461_v26 }
 0x529   : > { %v495_v29 = vpop.f32.mrf.mxu1 }
 0x52a   : > { %v496_v30 = vadd.f32 %v617_v27, %v495_v29 }
 0x52c   : > { %v499_v31 = vadd.f32 %v496_v30, %v212_v28 }
 0x52e   : > { %500 = vst.msk [vmem:[%s209_s23] sm:$0xff] %vm482_vm4, %v499_v31 }
 0x531   : > { %v497_v32 = vpop.f32.mrf.mxu1 }
 0x532 PF: > { %s14_s15 = sadd.s32 1, %s640_s15  }
 0x533   : > { %p11_p4 = scmp.ge.s32.totalorder %s14_s15, 4  }
 0x535   :  { %13 = sbr.rel (!%p11_p4) target bundleno = 1 (0x1), region = 69 }

</bundles_post_ra>
